<compile_context>
chip_gen: v5e
topology: v5e:2x2
jax: 0.10.0
libtpu: 0.0.40
codegen_flags: <defaults>
</compile_context>

<pallas_src>
import functools

import jax
import jax.numpy as jnp
from jax import lax
from jax.experimental import pallas as pl
from jax.experimental.pallas import tpu as pltpu
from jax.scipy.special import logsumexp

NEG_FILL = -1e9          # matches torch masked_fill value (reference only)
_NORM_EPS_SQ = 1e-24     # (F.normalize eps = 1e-12) ** 2


def _infonce_kernel(emb_ref, gq_ref, gk_ref, mk_ref, sum_ref, cnt_ref,
                    qn_sc, kn_sc, l_sc, p_sc, m_sc=None, *,
                    inv_temperature, n_valid, tk, use_fixed_max):
    kj = pl.program_id(1)
    nk = pl.num_programs(1)

    # ---- once per batch row: L2-normalize (F.normalize p=2, eps=1e-12) into
    # bf16 caches; fold 1/T into the query side only. ------------------------
    @pl.when(kj == 0)
    def _init():
        e32 = emb_ref[0].astype(jnp.float32)                      # (Nq, D)
        inv = lax.rsqrt(jnp.maximum(jnp.sum(e32 * e32, axis=-1, keepdims=True),
                                    _NORM_EPS_SQ))
        kn_sc[...] = (e32 * inv).astype(jnp.bfloat16)
        qn_sc[...] = (e32 * (inv * inv_temperature)).astype(jnp.bfloat16)
        l_sc[...] = jnp.zeros_like(l_sc)
        p_sc[...] = jnp.zeros_like(p_sc)
        if not use_fixed_max:
            m_sc[...] = jnp.full_like(m_sc, -jnp.inf)

    # ---- per key tile (skipped entirely for pure-padding tiles) -------------
    @pl.when(kj * tk < n_valid)
    def _tile():
        col0 = pl.multiple_of(kj * tk, tk)
        kn = kn_sc[pl.ds(col0, tk), :]                            # (tk, D) bf16
        # similarity tile on the MXU: bf16 in, f32 accumulate (A @ B^T).
        s = lax.dot_general(qn_sc[...], kn, (((1,), (1,)), ((), ())),
                            preferred_element_type=jnp.float32)   # (Nq, tk)
        nq = s.shape[0]

        mask_k = mk_ref[0]                                        # (1, tk) f32
        group_q = gq_ref[0]                                       # (Nq, 1) i32
        group_k = gk_ref[0]                                       # (1, tk) i32
        row_id = lax.broadcasted_iota(jnp.int32, (nq, tk), 0)
        col_id = lax.broadcasted_iota(jnp.int32, (nq, tk), 1) + kj * tk
        # groups_eff gives invalid / padded tokens pairwise-distinct sentinels,
        # so no validity terms are needed in the positive mask.
        positive = (group_q == group_k) & (row_id != col_id)      # (Nq, tk)

        if use_fixed_max:
            # Logits are bounded by 1/T, so a fixed max is exact and removes
            # the running-max recurrence + XLU row-max + alpha rescales.
            e = jnp.exp(s - inv_temperature) * mask_k             # 0 for invalid keys
            l_sc[...] += jnp.sum(e, axis=-1, keepdims=True)
            p_sc[...] += jnp.sum(jnp.where(positive, e, 0.0),
                                 axis=-1, keepdims=True)
        else:
            # Online shared-max fallback for very small temperatures.
            # TODO(synk): keep a separate positive running max so p cannot
            # underflow for extreme temperatures (< ~0.001).
            m_prev = m_sc[...]
            m_new = jnp.maximum(m_prev, jnp.max(s, axis=-1, keepdims=True))
            alpha = jnp.exp(m_prev - m_new)
            e = jnp.exp(s - m_new) * mask_k
            l_sc[...] = alpha * l_sc[...] + jnp.sum(e, axis=-1, keepdims=True)
            p_sc[...] = alpha * p_sc[...] + jnp.sum(jnp.where(positive, e, 0.0),
                                                    axis=-1, keepdims=True)
            m_sc[...] = m_new

    # ---- finalize: per-batch partial sum / count ----------------------------
    @pl.when(kj == nk - 1)
    def _finalize():
        l = l_sc[...]
        p = p_sc[...]
        has_pos = p > 0.0
        # loss = -(num - denom) = (m + log l) - (m + log p) = log l - log p
        loss_tok = jnp.where(has_pos,
                             jnp.log(l) - jnp.log(jnp.maximum(p, 1e-37)),
                             0.0)
        total = jnp.sum(loss_tok)
        count = jnp.sum(has_pos.astype(jnp.float32))
        # Lane-dense (1, 8, 128) per-batch partial outputs (unmasked stores).
        sum_ref[...] = jnp.full(sum_ref.shape, total, dtype=jnp.float32)
        cnt_ref[...] = jnp.full(cnt_ref.shape, count, dtype=jnp.float32)


def _round_up(x, m):
    return ((x + m - 1) // m) * m


def _pick_tiles(n, d, emb_itemsize, n_vec_scratch):
    """Generation-aware key-tile size and VMEM limit."""
    n_pad0 = _round_up(max(n, 8), 128)
    try:
        vmem_cap = int(pltpu.get_tpu_info().vmem_capacity_bytes)
    except Exception:                       # info unavailable -> be conservative
        vmem_cap = 64 * 1024 * 1024         # v7x per-core VMEM
    vmem_limit = min(int(vmem_cap * 0.6), 100 * 1024 * 1024)

    # Bytes that do not scale with the key tile size:
    fixed = (
        2 * n_pad0 * d * emb_itemsize       # double-buffered (1, n_pad, D) emb block
        + 2 * n_pad0 * d * 2                # qn / kn bf16 caches
        + 2 * n_pad0 * d * 4                # one-time f32 normalization transient
        + n_vec_scratch * n_pad0 * 128 * 4  # (n_pad, 1) scratches lane-pad to 128
        + 2 * n_pad0 * 128 * 4              # (n_pad, 1) group column view, 2 buffers
        + 4 * 8 * 128 * 4 * 2               # partial-sum outputs
    )
    budget = vmem_limit - fixed - (2 << 20)
    # ~6 live (n_pad, tk) f32 temporaries in the per-tile body.
    tk = max(budget, 0) // (6 * 4 * n_pad0)
    tk = int(tk) // 128 * 128
    tk = max(128, min(tk, 2048, n_pad0))
    n_pad = _round_up(n_pad0, tk)
    return n_pad, tk, vmem_limit


def infonce_loss(embeddings, groups, mask, temperature=0.07):
    """Pallas TPU implementation of InfoNCELoss.forward.

    Args:
      embeddings: [B, N, D] float array (f32 or bf16).
      groups:     [B, N] integer group labels.
      mask:       [B, N] binary validity mask.
    Returns:
      scalar float32 loss.
    """
    B, N, D = embeddings.shape
    use_fixed_max = float(temperature) >= 0.02   # logit spread 2/T < ~100
    n_vec_scratch = 2 if use_fixed_max else 3
    emb_itemsize = jnp.dtype(embeddings.dtype).itemsize
    n_pad, tk, vmem_limit = _pick_tiles(N, D, emb_itemsize, n_vec_scratch)
    # TODO(synk): add a parallel query-tile grid axis (with a key-normalization
    # pre-pass) for N*D too large for the resident query block + bf16 caches —
    # matters on v7x (64 MiB VMEM) and for megacore utilization at small B.

    pad = n_pad - N
    emb_p = jnp.pad(embeddings, ((0, 0), (0, pad), (0, 0)))
    mask_p = jnp.pad(mask.astype(jnp.float32), ((0, 0), (0, pad)))
    groups_p = jnp.pad(groups.astype(jnp.int32), ((0, 0), (0, pad)))

    # Sentinel groups: invalid / padded tokens get pairwise-distinct labels that
    # are strictly below every real group label, so group equality alone (plus
    # the diagonal exclusion) is the exact positive mask.
    # (Assumes real group labels stay well inside the int32 range.)
    sentinel_base = jnp.min(groups.astype(jnp.int32)) - 1
    token_idx = jnp.arange(n_pad, dtype=jnp.int32)[None, :]
    groups_eff = jnp.where(mask_p != 0.0, groups_p, sentinel_base - token_idx)

    gq = groups_eff[:, :, None]    # (B, n_pad, 1) column view (no in-kernel transpose)
    gk = groups_eff[:, None, :]    # (B, 1, n_pad) row view
    mk = mask_p[:, None, :]        # (B, 1, n_pad) key-validity row view

    nk = n_pad // tk
    kernel = functools.partial(_infonce_kernel,
                               inv_temperature=float(1.0 / temperature),
                               n_valid=N, tk=tk,
                               use_fixed_max=use_fixed_max)

    scratch_shapes = [
        pltpu.VMEM((n_pad, D), jnp.bfloat16),   # qn cache (1/T folded)
        pltpu.VMEM((n_pad, D), jnp.bfloat16),   # kn cache
        pltpu.VMEM((n_pad, 1), jnp.float32),    # running denom exp-sum
        pltpu.VMEM((n_pad, 1), jnp.float32),    # running positive exp-sum
    ]
    if not use_fixed_max:
        scratch_shapes.append(pltpu.VMEM((n_pad, 1), jnp.float32))  # running max

    sums, cnts = pl.pallas_call(
        kernel,
        out_shape=(jax.ShapeDtypeStruct((B, 8, 128), jnp.float32),
                   jax.ShapeDtypeStruct((B, 8, 128), jnp.float32)),
        grid_spec=pltpu.PrefetchScalarGridSpec(
            num_scalar_prefetch=0,
            grid=(B, nk),
            in_specs=[
                pl.BlockSpec((1, n_pad, D), lambda b, kj: (b, 0, 0)),  # embeddings
                pl.BlockSpec((1, n_pad, 1), lambda b, kj: (b, 0, 0)),  # groups (col)
                pl.BlockSpec((1, 1, tk), lambda b, kj: (b, 0, kj)),    # groups (row)
                pl.BlockSpec((1, 1, tk), lambda b, kj: (b, 0, kj)),    # mask   (row)
            ],
            out_specs=(
                pl.BlockSpec((1, 8, 128), lambda b, kj: (b, 0, 0)),
                pl.BlockSpec((1, 8, 128), lambda b, kj: (b, 0, 0)),
            ),
            scratch_shapes=scratch_shapes,
        ),
        compiler_params=pltpu.CompilerParams(
            dimension_semantics=("parallel", "arbitrary"),
            vmem_limit_bytes=int(vmem_limit),
        ),
    )(emb_p, gq, gk, mk)

    total = jnp.sum(sums[:, 0, 0])
    count = jnp.sum(cnts[:, 0, 0])
    # PyTorch: if no token has a positive, return 0.0; else mean over them.
    return jnp.where(count > 0, total / count, jnp.float32(0.0))


def _reference_loss(embeddings, groups, mask, temperature=0.07,
                    matmul_dtype=None):
    """Pure-JAX reference mirroring the PyTorch module.

    If matmul_dtype is given, the normalized operands are rounded to that dtype
    (mirroring the kernel's bf16 MXU matmul with f32 accumulation).
    """
    emb = embeddings.astype(jnp.float32)
    inv_norm = lax.rsqrt(jnp.maximum(jnp.sum(emb * emb, axis=-1, keepdims=True),
                                     _NORM_EPS_SQ))
    if matmul_dtype is not None:
        qn = (emb * (inv_norm * (1.0 / temperature))).astype(matmul_dtype)
        kn = (emb * inv_norm).astype(matmul_dtype)
        sim = jnp.einsum("bnd,bmd->bnm", qn, kn,
                         preferred_element_type=jnp.float32)
    else:
        emb_n = emb * inv_norm
        sim = jnp.einsum("bnd,bmd->bnm", emb_n, emb_n,
                         precision=lax.Precision.HIGHEST) / temperature
    valid = mask != 0
    valid_pair = valid[:, :, None] & valid[:, None, :]
    group_eq = groups[:, :, None] == groups[:, None, :]
    N = emb.shape[1]
    diag = jnp.eye(N, dtype=bool)[None]
    positive = group_eq & (~diag) & valid_pair
    logits = jnp.where(valid_pair, sim, NEG_FILL)
    denom = logsumexp(logits, axis=-1)
    pos_logits = jnp.where(positive, logits, NEG_FILL)
    num = logsumexp(pos_logits, axis=-1)
    loss_tok = -(num - denom)
    has_pos = jnp.any(positive, axis=-1)
    cnt = jnp.sum(has_pos)
    total = jnp.sum(jnp.where(has_pos, loss_tok, 0.0))
    return jnp.where(cnt > 0, total / cnt, jnp.float32(0.0))


if __name__ == "__main__":
    B, N, D = 2, 8, 32
    key = jax.random.PRNGKey(0)
    k_emb, k_grp, k_msk = jax.random.split(key, 3)

    embeddings = jax.random.normal(k_emb, (B, N, D), dtype=jnp.float32)
    groups = jax.random.randint(k_grp, (B, N), 0, 3, dtype=jnp.int32)
    mask = (jax.random.uniform(k_msk, (B, N)) < 0.8).astype(jnp.float32)

    loss = jax.block_until_ready(
        infonce_loss(embeddings, groups, mask, temperature=0.07))

    # Tight check vs. a reference that mirrors the kernel's bf16 matmul.
    ref_bf16 = jax.block_until_ready(
        _reference_loss(embeddings, groups, mask, 0.07,
                        matmul_dtype=jnp.bfloat16))
    assert jnp.allclose(loss, ref_bf16, rtol=2e-3, atol=2e-3), (loss, ref_bf16)

    # Loose sanity check vs. the exact f32 reference (bf16 logits differ ~1e-2).
    ref_f32 = jax.block_until_ready(
        _reference_loss(embeddings, groups, mask, 0.07))
    assert jnp.allclose(loss, ref_f32, rtol=1e-1, atol=1e-1), (loss, ref_f32)

    print("KERNEL_OK")
</pallas_src>

<mosaic_0001>
module attributes {stable_mosaic.version = 11 : i64} {
  func.func @_infonce_kernel(%arg0: i32, %arg1: i32, %arg2: memref<1x128x32xf32, #tpu.memory_space<vmem>>, %arg3: memref<1x128x1xi32, #tpu.memory_space<vmem>>, %arg4: memref<1x1x128xi32, #tpu.memory_space<vmem>>, %arg5: memref<1x1x128xf32, #tpu.memory_space<vmem>>, %arg6: memref<1x8x128xf32, #tpu.memory_space<vmem>>, %arg7: memref<1x8x128xf32, #tpu.memory_space<vmem>>, %arg8: memref<128x32xbf16, #tpu.memory_space<vmem>>, %arg9: memref<128x32xbf16, #tpu.memory_space<vmem>>, %arg10: memref<128x1xf32, #tpu.memory_space<vmem>>, %arg11: memref<128x1xf32, #tpu.memory_space<vmem>>) attributes {dimension_semantics = [#tpu.dimension_semantics<parallel>, #tpu.dimension_semantics<arbitrary>], iteration_bounds = array<i64: 2, 1>, scalar_prefetch = 0 : i64, scratch_operands = 4 : i64, tpu.core_type = #tpu.core_type<tc>, window_params = [{transform_indices = @transform_0, window_bounds = array<i64: 1, 128, 32>}, {transform_indices = @transform_1, window_bounds = array<i64: 1, 128, 1>}, {transform_indices = @transform_2, window_bounds = array<i64: 1, 1, 128>}, {transform_indices = @transform_3, window_bounds = array<i64: 1, 1, 128>}, {transform_indices = @transform_4, window_bounds = array<i64: 1, 8, 128>}, {transform_indices = @transform_5, window_bounds = array<i64: 1, 8, 128>}]} {
    %c0_i32 = arith.constant 0 : i32
    %0 = arith.cmpi eq, %arg1, %c0_i32 : i32
    %1 = arith.extui %0 : i1 to i32
    %c0_i32_0 = arith.constant 0 : i32
    %2 = arith.cmpi ne, %1, %c0_i32_0 : i32
    scf.if %2 {
      %c0 = arith.constant 0 : index
      %c0_4 = arith.constant 0 : index
      %c0_5 = arith.constant 0 : index
      %10 = vector.load %arg2[%c0, %c0_4, %c0_5] : memref<1x128x32xf32, #tpu.memory_space<vmem>>, vector<1x128x32xf32>
      %11 = vector.shape_cast %10 : vector<1x128x32xf32> to vector<128x32xf32>
      %12 = arith.mulf %11, %11 : vector<128x32xf32>
      %cst = arith.constant dense<0.000000e+00> : vector<128xf32>
      %13 = vector.multi_reduction <add>, %12, %cst [1] : vector<128x32xf32> to vector<128xf32>
      %14 = vector.shape_cast %13 : vector<128xf32> to vector<128x1xf32>
      %cst_6 = arith.constant 1.000000e-24 : f32
      %15 = vector.broadcast %cst_6 : f32 to vector<128x1xf32>
      %16 = arith.maximumf %14, %15 : vector<128x1xf32>
      %17 = math.rsqrt %16 : vector<128x1xf32>
      %18 = vector.broadcast %17 : vector<128x1xf32> to vector<128x32xf32>
      %19 = arith.mulf %11, %18 : vector<128x32xf32>
      %20 = arith.truncf %19 : vector<128x32xf32> to vector<128x32xbf16>
      %c0_7 = arith.constant 0 : index
      %c0_8 = arith.constant 0 : index
      %21 = vector.load %arg9[%c0_7, %c0_8] : memref<128x32xbf16, #tpu.memory_space<vmem>>, vector<128x32xbf16>
      tpu.vector_store %arg9[%c0_7, %c0_8], %20 {strides = array<i32>} : memref<128x32xbf16, #tpu.memory_space<vmem>>, vector<128x32xbf16>,
      %cst_9 = arith.constant 14.2857141 : f32
      %22 = vector.broadcast %cst_9 : f32 to vector<128x1xf32>
      %23 = arith.mulf %17, %22 : vector<128x1xf32>
      %24 = vector.broadcast %23 : vector<128x1xf32> to vector<128x32xf32>
      %25 = arith.mulf %11, %24 : vector<128x32xf32>
      %26 = arith.truncf %25 : vector<128x32xf32> to vector<128x32xbf16>
      %c0_10 = arith.constant 0 : index
      %c0_11 = arith.constant 0 : index
      %27 = vector.load %arg8[%c0_10, %c0_11] : memref<128x32xbf16, #tpu.memory_space<vmem>>, vector<128x32xbf16>
      tpu.vector_store %arg8[%c0_10, %c0_11], %26 {strides = array<i32>} : memref<128x32xbf16, #tpu.memory_space<vmem>>, vector<128x32xbf16>,
      %cst_12 = arith.constant 0.000000e+00 : f32
      %28 = vector.broadcast %cst_12 : f32 to vector<128x1xf32>
      %c0_13 = arith.constant 0 : index
      %c0_14 = arith.constant 0 : index
      %29 = vector.load %arg10[%c0_13, %c0_14] : memref<128x1xf32, #tpu.memory_space<vmem>>, vector<128x1xf32>
      tpu.vector_store %arg10[%c0_13, %c0_14], %28 {strides = array<i32>} : memref<128x1xf32, #tpu.memory_space<vmem>>, vector<128x1xf32>,
      %cst_15 = arith.constant 0.000000e+00 : f32
      %30 = vector.broadcast %cst_15 : f32 to vector<128x1xf32>
      %c0_16 = arith.constant 0 : index
      %c0_17 = arith.constant 0 : index
      %31 = vector.load %arg11[%c0_16, %c0_17] : memref<128x1xf32, #tpu.memory_space<vmem>>, vector<128x1xf32>
      tpu.vector_store %arg11[%c0_16, %c0_17], %30 {strides = array<i32>} : memref<128x1xf32, #tpu.memory_space<vmem>>, vector<128x1xf32>,
    } else {
    }
    %c128_i32 = arith.constant 128 : i32
    %3 = arith.muli %arg1, %c128_i32 : i32
    %c8_i32 = arith.constant 8 : i32
    %4 = arith.cmpi slt, %3, %c8_i32 : i32
    %5 = arith.extui %4 : i1 to i32
    %c0_i32_1 = arith.constant 0 : i32
    %6 = arith.cmpi ne, %5, %c0_i32_1 : i32
    scf.if %6 {
      %c128_i32_4 = arith.constant 128 : i32
      %10 = arith.muli %arg1, %c128_i32_4 : i32
      %11 = tpu.assume_multiple %10, 128 : i32
      %12 = arith.index_cast %11 : i32 to index
      %c0 = arith.constant 0 : index
      %13 = vector.load %arg9[%12, %c0] : memref<128x32xbf16, #tpu.memory_space<vmem>>, vector<128x32xbf16>
      %c0_5 = arith.constant 0 : index
      %c0_6 = arith.constant 0 : index
      %14 = vector.load %arg8[%c0_5, %c0_6] : memref<128x32xbf16, #tpu.memory_space<vmem>>, vector<128x32xbf16>
      %cst = arith.constant dense<0.000000e+00> : vector<128x128xf32>
      %15 = tpu.matmul %14, %13, %cst {dimension_numbers = #tpu.dot_dimension_numbers<[1], [1], [0], [0], [0, 0, 1, 0], [], []>} : vector<128x32xbf16>, vector<128x32xbf16>, vector<128x128xf32> -> vector<128x128xf32>
      %c0_7 = arith.constant 0 : index
      %c0_8 = arith.constant 0 : index
      %c0_9 = arith.constant 0 : index
      %16 = vector.load %arg5[%c0_7, %c0_8, %c0_9] : memref<1x1x128xf32, #tpu.memory_space<vmem>>, vector<1x1x128xf32>
      %17 = vector.shape_cast %16 : vector<1x1x128xf32> to vector<1x128xf32>
      %c0_10 = arith.constant 0 : index
      %c0_11 = arith.constant 0 : index
      %c0_12 = arith.constant 0 : index
      %18 = vector.load %arg3[%c0_10, %c0_11, %c0_12] : memref<1x128x1xi32, #tpu.memory_space<vmem>>, vector<1x128x1xi32>
      %19 = vector.shape_cast %18 : vector<1x128x1xi32> to vector<128x1xi32>
      %c0_13 = arith.constant 0 : index
      %c0_14 = arith.constant 0 : index
      %c0_15 = arith.constant 0 : index
      %20 = vector.load %arg4[%c0_13, %c0_14, %c0_15] : memref<1x1x128xi32, #tpu.memory_space<vmem>>, vector<1x1x128xi32>
      %21 = vector.shape_cast %20 : vector<1x1x128xi32> to vector<1x128xi32>
      %22 = tpu.iota {dimensions = array<i32: 0>} : vector<128x128xi32>
      %23 = tpu.iota {dimensions = array<i32: 1>} : vector<128x128xi32>
      %c128_i32_16 = arith.constant 128 : i32
      %24 = arith.muli %arg1, %c128_i32_16 : i32
      %25 = vector.broadcast %24 : i32 to vector<128x128xi32>
      %26 = arith.addi %23, %25 : vector<128x128xi32>
      %27 = vector.broadcast %19 : vector<128x1xi32> to vector<128x128xi32>
      %28 = vector.broadcast %21 : vector<1x128xi32> to vector<128x128xi32>
      %29 = arith.cmpi eq, %27, %28 : vector<128x128xi32>
      %30 = arith.cmpi ne, %22, %26 : vector<128x128xi32>
      %31 = arith.andi %29, %30 : vector<128x128xi1>
      %cst_17 = arith.constant 14.2857141 : f32
      %32 = vector.broadcast %cst_17 : f32 to vector<128x128xf32>
      %33 = arith.subf %15, %32 : vector<128x128xf32>
      %34 = math.exp %33 : vector<128x128xf32>
      %35 = vector.broadcast %17 : vector<1x128xf32> to vector<128x128xf32>
      %36 = arith.mulf %34, %35 : vector<128x128xf32>
      %c0_18 = arith.constant 0 : index
      %c0_19 = arith.constant 0 : index
      %37 = vector.load %arg10[%c0_18, %c0_19] : memref<128x1xf32, #tpu.memory_space<vmem>>, vector<128x1xf32>
      %cst_20 = arith.constant dense<0.000000e+00> : vector<128xf32>
      %38 = vector.multi_reduction <add>, %36, %cst_20 [1] : vector<128x128xf32> to vector<128xf32>
      %39 = vector.shape_cast %38 : vector<128xf32> to vector<128x1xf32>
      %40 = arith.addf %37, %39 : vector<128x1xf32>
      %c0_21 = arith.constant 0 : index
      %c0_22 = arith.constant 0 : index
      %41 = vector.load %arg10[%c0_21, %c0_22] : memref<128x1xf32, #tpu.memory_space<vmem>>, vector<128x1xf32>
      tpu.vector_store %arg10[%c0_21, %c0_22], %40 {strides = array<i32>} : memref<128x1xf32, #tpu.memory_space<vmem>>, vector<128x1xf32>,
      %c0_23 = arith.constant 0 : index
      %c0_24 = arith.constant 0 : index
      %42 = vector.load %arg11[%c0_23, %c0_24] : memref<128x1xf32, #tpu.memory_space<vmem>>, vector<128x1xf32>
      %cst_25 = arith.constant 0.000000e+00 : f32
      %43 = vector.broadcast %cst_25 : f32 to vector<128x128xf32>
      %44 = arith.select %31, %36, %43 : vector<128x128xi1>, vector<128x128xf32>
      %cst_26 = arith.constant dense<0.000000e+00> : vector<128xf32>
      %45 = vector.multi_reduction <add>, %44, %cst_26 [1] : vector<128x128xf32> to vector<128xf32>
      %46 = vector.shape_cast %45 : vector<128xf32> to vector<128x1xf32>
      %47 = arith.addf %42, %46 : vector<128x1xf32>
      %c0_27 = arith.constant 0 : index
      %c0_28 = arith.constant 0 : index
      %48 = vector.load %arg11[%c0_27, %c0_28] : memref<128x1xf32, #tpu.memory_space<vmem>>, vector<128x1xf32>
      tpu.vector_store %arg11[%c0_27, %c0_28], %47 {strides = array<i32>} : memref<128x1xf32, #tpu.memory_space<vmem>>, vector<128x1xf32>,
    } else {
    }
    %c0_i32_2 = arith.constant 0 : i32
    %7 = arith.cmpi eq, %arg1, %c0_i32_2 : i32
    %8 = arith.extui %7 : i1 to i32
    %c0_i32_3 = arith.constant 0 : i32
    %9 = arith.cmpi ne, %8, %c0_i32_3 : i32
    scf.if %9 {
      %c0 = arith.constant 0 : index
      %c0_4 = arith.constant 0 : index
      %10 = vector.load %arg10[%c0, %c0_4] : memref<128x1xf32, #tpu.memory_space<vmem>>, vector<128x1xf32>
      %c0_5 = arith.constant 0 : index
      %c0_6 = arith.constant 0 : index
      %11 = vector.load %arg11[%c0_5, %c0_6] : memref<128x1xf32, #tpu.memory_space<vmem>>, vector<128x1xf32>
      %cst = arith.constant 0.000000e+00 : f32
      %12 = vector.broadcast %cst : f32 to vector<128x1xf32>
      %13 = arith.cmpf ogt, %11, %12 : vector<128x1xf32>
      %14 = math.log %10 : vector<128x1xf32>
      %cst_7 = arith.constant 9.99999991E-38 : f32
      %15 = vector.broadcast %cst_7 : f32 to vector<128x1xf32>
      %16 = arith.maximumf %11, %15 : vector<128x1xf32>
      %17 = math.log %16 : vector<128x1xf32>
      %18 = arith.subf %14, %17 : vector<128x1xf32>
      %cst_8 = arith.constant 0.000000e+00 : f32
      %19 = vector.broadcast %cst_8 : f32 to vector<128x1xf32>
      %20 = arith.select %13, %18, %19 : vector<128x1xi1>, vector<128x1xf32>
      %21 = vector.shape_cast %20 : vector<128x1xf32> to vector<1x128x1xf32>
      %cst_9 = arith.constant dense<0.000000e+00> : vector<1xf32>
      %22 = vector.multi_reduction <add>, %21, %cst_9 [1, 2] : vector<1x128x1xf32> to vector<1xf32>
      %23 = vector.shape_cast %22 : vector<1xf32> to vector<1x1x1xf32>
      %24 = vector.extract %23[0, 0, 0] : f32 from vector<1x1x1xf32>
      %25 = arith.extui %13 : vector<128x1xi1> to vector<128x1xi32>
      %26 = arith.sitofp %25 : vector<128x1xi32> to vector<128x1xf32>
      %27 = vector.shape_cast %26 : vector<128x1xf32> to vector<1x128x1xf32>
      %cst_10 = arith.constant dense<0.000000e+00> : vector<1xf32>
      %28 = vector.multi_reduction <add>, %27, %cst_10 [1, 2] : vector<1x128x1xf32> to vector<1xf32>
      %29 = vector.shape_cast %28 : vector<1xf32> to vector<1x1x1xf32>
      %30 = vector.extract %29[0, 0, 0] : f32 from vector<1x1x1xf32>
      %31 = vector.broadcast %24 : f32 to vector<1x8x128xf32>
      %c0_11 = arith.constant 0 : index
      %c0_12 = arith.constant 0 : index
      %c0_13 = arith.constant 0 : index
      %32 = vector.load %arg6[%c0_11, %c0_12, %c0_13] : memref<1x8x128xf32, #tpu.memory_space<vmem>>, vector<1x8x128xf32>
      tpu.vector_store %arg6[%c0_11, %c0_12, %c0_13], %31 {strides = array<i32>} : memref<1x8x128xf32, #tpu.memory_space<vmem>>, vector<1x8x128xf32>,
      %33 = vector.broadcast %30 : f32 to vector<1x8x128xf32>
      %c0_14 = arith.constant 0 : index
      %c0_15 = arith.constant 0 : index
      %c0_16 = arith.constant 0 : index
      %34 = vector.load %arg7[%c0_14, %c0_15, %c0_16] : memref<1x8x128xf32, #tpu.memory_space<vmem>>, vector<1x8x128xf32>
      tpu.vector_store %arg7[%c0_14, %c0_15, %c0_16], %33 {strides = array<i32>} : memref<1x8x128xf32, #tpu.memory_space<vmem>>, vector<1x8x128xf32>,
    } else {
    }
    return
  }
  func.func @transform_0(%arg0: i32, %arg1: i32) -> (i32, i32, i32) {
    %c0_i32 = arith.constant 0 : i32
    %c0_i32_0 = arith.constant 0 : i32
    %c0_i32_1 = arith.constant 0 : i32
    return %arg0, %c0_i32, %c0_i32_0 : i32, i32, i32
  }
  func.func @transform_1(%arg0: i32, %arg1: i32) -> (i32, i32, i32) {
    %c0_i32 = arith.constant 0 : i32
    %c0_i32_0 = arith.constant 0 : i32
    %c0_i32_1 = arith.constant 0 : i32
    return %arg0, %c0_i32, %c0_i32_0 : i32, i32, i32
  }
  func.func @transform_2(%arg0: i32, %arg1: i32) -> (i32, i32, i32) {
    %c0_i32 = arith.constant 0 : i32
    %c0_i32_0 = arith.constant 0 : i32
    return %arg0, %c0_i32, %arg1 : i32, i32, i32
  }
  func.func @transform_3(%arg0: i32, %arg1: i32) -> (i32, i32, i32) {
    %c0_i32 = arith.constant 0 : i32
    %c0_i32_0 = arith.constant 0 : i32
    return %arg0, %c0_i32, %arg1 : i32, i32, i32
  }
  func.func @transform_4(%arg0: i32, %arg1: i32) -> (i32, i32, i32) {
    %c0_i32 = arith.constant 0 : i32
    %c0_i32_0 = arith.constant 0 : i32
    %c0_i32_1 = arith.constant 0 : i32
    return %arg0, %c0_i32, %c0_i32_0 : i32, i32, i32
  }
  func.func @transform_5(%arg0: i32, %arg1: i32) -> (i32, i32, i32) {
    %c0_i32 = arith.constant 0 : i32
    %c0_i32_0 = arith.constant 0 : i32
    %c0_i32_1 = arith.constant 0 : i32
    return %arg0, %c0_i32, %c0_i32_0 : i32, i32, i32
  }
}

</mosaic_0001>

<bundles_post_ra>
// kernel: tpu_custom_call.1
= control target key start
LH: loop header
LB: loop body
LE: loop exit
PB: predicated region body
PF: predicated region fallthrough
CT: control target
= control target key end

     0   :  { %11 = vsyncpa [#allocation7], 0  ;;  %s3332_s0 = inlined_call_operand.vmem [shape: f32[2,128,32], index: 0, kind: input, shape index: {}]   ;;  %s3333_s1 = inlined_call_operand.vmem [shape: s32[2,128,1], index: 1, kind: input, shape index: {}]   ;;  %s3334_s2 = inlined_call_operand.vmem [shape: s32[2,1,128], index: 2, kind: input, shape index: {}]   ;;  %s3335_s3 = inlined_call_operand.vmem [shape: f32[2,1,128], index: 3, kind: input, shape index: {}]   ;;  %s3336_s4 = inlined_call_operand.hbm [shape: f32[2,8,128], index: 4, kind: output, shape index: {0}]   ;;  %s3337_s5 = inlined_call_operand.hbm [shape: f32[2,8,128], index: 5, kind: output, shape index: {1}]  }
   0x1   :  { %13 = vsyncpa [#allocation7 + $0x1], 0 }
   0x2   :  { %14 = vsyncpa [#allocation9], 0 }
   0x3   :  { %16 = vsyncpa [#allocation9 + $0x1], 0  ;;  %s2281_s18 = smov 0   ;;  %s2283_s19 = smov 0  }
   0x4   :  { %s2285_s20 = smov 0   ;;  %s2287_s21 = smov 0  }
   0x5   :  { %s2289_s22 = smov 0   ;;  %s2291_s23 = smov 0  }
   0x6 LB: > { %s1775_s24 = sadd.s32 4294967295, %s2247_s23   ;;  %s1776_s25 = sadd.s32 4294967294, %s2247_s23   ;;  %s2247_s23 = sphi %s2291_s23, %s22_s23   ;;  %s2243_s22 = sphi %s2289_s22, %s3368_s22   ;;  %s2239_s21 = sphi %s2287_s21, %s3367_s21   ;;  %s2235_s20 = sphi %s2285_s20, %s3366_s20   ;;  %s2231_s19 = sphi %s2283_s19, %s3365_s19   ;;  %s2227_s18 = sphi %s2281_s18, %s3364_s18  }
   0x7   : > { %s34_s26 = sadd.s32 1, %s2243_s22  ;;  %s149_s27 = sadd.s32 1, %s2235_s20 }
   0x8   : > { %p36_p0 = scmp.ge.s32.totalorder %s34_s26, 2  ;;  %p159_p1 = scmp.ne.s32.totalorder %s2235_s20, %s2231_s19 }
   0x9   : > { %p160_p2 = scmp.eq.s32.totalorder %s1775_s24, 1  ;;  %p165_p3 = scmp.ne.s32.totalorder %s2231_s19, %s2227_s18 }
   0xa   : > { %s3370_s26 = smov (%p36_p0, %s34_s26), 0  ;;  %p166_p5 = scmp.eq.s32.totalorder %s1776_s25, 1 }
   0xb   : > { %p2321_p4 = por %p160_p2, %p159_p1  ;;  %s146_s29 = ssub.s32 %s2243_s22, %s3370_s26 }
   0xc   : > { %p1779_p6 = scmp.ge.s32.totalorder %s2247_s23, 1  ;;  %p147_p7 = scmp.eq.s32.totalorder %s146_s29, 0 }
   0xd   : > { %p2328_p8 = por %p166_p5, %p165_p3  ;;  %p244_p9 = scmp.lt.s32.totalorder %s2247_s23, 3 }
   0xe   : > { %s2334_s6 = scalar_select %p147_p7, %s2235_s20, %s149_s27  }
   0xf   : > { %p245_p10 = pnand %p1779_p6, %p244_p9 }
  0x10   : > { %p294_p11 = scmp.lt.s32.totalorder (!%p245_p10), %s2239_s21, 1  ;;  %s1892_s12 = sshll.u32 (!%p245_p10), %s2239_s21, 3 }
  0x11   : > { %248 = sbr.rel (%p245_p10) target bundleno = 822 (0x336), region = 36  ;;  %s1618_s15 = scalar_lea.hbm (!%p245_p10), %s3336_s4, %s1892_s12 }
  0x12   : > { %s1622_s9 = sshll.u32 (!%p245_p10), %s1618_s15, 4  ;;  %s2157_s25 = scalar_lea.hbm (!%p245_p10), %s3336_s4, 16  ;;  %s1623_s9 = int_to_ptr.hbm [resolvable:$true] %s1622_s9 }
  0x13   : > { %s2151_s24 = sshra.s32 (!%p245_p10), %s1623_s9, 4  ;;  %s2152_s24 = int_to_ptr.hbm [resolvable:$true] %s2151_s24 }
  0x14   : > { %p2158_p1 = scmp.lt.s32.totalorder (!%p245_p10), %s2152_s24, %s3336_s4 }
  0x16   : > { %s2338_s7 = scalar_select %p294_p11, %s2239_s21, 1  ;;  %vm352_vm0 = vcmask 261120   ;;  %vm609_vm1 = vcmask 257024  }
  0x18   : > { %s1896_s8 = sshll.u32 %s2338_s7, 7  ;;  %s309_s11 = scalar_lea.vmem %s3334_s2, %s2338_s7 }
  0x19   : > { %s2350_s14 = scalar_lea.vmem %s3332_s0, %s1896_s8  ;;  %s315_s17 = scalar_lea.vmem %s3335_s3, %s2338_s7 }
  0x1a   : > { %v2357_v0 = vld [vmem:[%s2350_s14 + $0x70] sm:$0xff]  ;;  %v2362_v2 = vld [vmem:[%s2350_s14 + $0x60] sm:$0xff]  ;;  %v2372_v6 = vld [vmem:[%s2350_s14 + $0x78] sm:$0xff]  ;;  %s2686_s27 = scalar_lea.vmem %s3333_s1, %s1896_s8  ;;  %s3271_s7 = sand.u32 1, %s2231_s19  }
  0x1b   : > { %v350_v1 = vmul.f32 %v2357_v0, %v2357_v0  ;;  %v2365_v3 = vld [vmem:[%s2350_s14 + $0x50] sm:$0xff]  ;;  %v348_v4 = vmul.f32 %v2362_v2, %v2362_v2  ;;  %v2376_v8 = vld [vmem:[%s2350_s14 + $0x68] sm:$0xff]  ;;  %v2379_v9 = vld [vmem:[%s2350_s14 + $0x58] sm:$0xff]  ;;  %v351_v12 = vmul.f32 %v2372_v6, %v2372_v6 }
  0x1c   : > { %v346_v5 = vmul.f32 %v2365_v3, %v2365_v3  ;;  %v349_v13 = vmul.f32 %v2376_v8, %v2376_v8  ;;  %v347_v14 = vmul.f32 %v2379_v9, %v2379_v9  ;;  %v2393_v18 = vld [vmem:[%s2350_s14 + $0x40] sm:$0xff]  ;;  %v2396_v19 = vld [vmem:[%s2350_s14 + $0x48] sm:$0xff]  ;;  %v2399_v20 = vld [vmem:[%s2350_s14 + $0x30] sm:$0xff] }
  0x1d   : > { %v395_v7 = vsel %vm352_vm0, %v350_v1, 0.0  ;;  %v389_v10 = vsel %vm352_vm0, %v348_v4, 0.0  ;;  %v398_v15 = vsel %vm352_vm0, %v351_v12, 0.0  ;;  %v344_v21 = vmul.f32 %v2393_v18, %v2393_v18  ;;  %v2410_v26 = vld [vmem:[%s2350_s14 + $0x38] sm:$0xff]  ;;  %v2414_v28 = vld [vmem:[%s2350_s14 + $0x28] sm:$0xff]  ;;  %v2417_v29 = vld [vmem:[%s2350_s14 + $0x20] sm:$0xff] }
  0x1e   : > { %396 = vadd.xlane.f32.xlu0 %v395_v7  ;;  %v383_v11 = vsel %vm352_vm0, %v346_v5, 0.0  ;;  %390 = vadd.xlane.f32.xlu1 %v389_v10  ;;  %v392_v16 = vsel %vm352_vm0, %v349_v13, 0.0  ;;  %v386_v17 = vsel %vm352_vm0, %v347_v14, 0.0  ;;  %v345_v22 = vmul.f32 %v2396_v19, %v2396_v19  ;;  %v2429_v36 = vld [vmem:[%s2350_s14 + $0x10] sm:$0xff]  ;;  %v2432_v37 = vld [vmem:[%s2350_s14 + $0x18] sm:$0xff]  ;;  %v2435_v38 = vld [vmem:[%s2350_s14] sm:$0xff] }
  0x1f   : > { %384 = vadd.xlane.f32.xlu2 %v383_v11  ;;  %v342_v23 = vmul.f32 %v2399_v20, %v2399_v20  ;;  %v377_v24 = vsel %vm352_vm0, %v344_v21, 0.0  ;;  %v343_v30 = vmul.f32 %v2410_v26, %v2410_v26  ;;  %v341_v31 = vmul.f32 %v2414_v28, %v2414_v28  ;;  %v2446_v44 = vld [vmem:[%s2350_s14 + $0x8] sm:$0xff]  ;;  %s1603_s14 = scalar_lea.sflag [#allocation7], %s3271_s7 }
  0x20   : > { %v380_v25 = vsel %vm352_vm0, %v345_v22, 0.0  ;;  %v340_v32 = vmul.f32 %v2417_v29, %v2417_v29  ;;  %v338_v39 = vmul.f32 %v2429_v36, %v2429_v36  ;;  %v339_v40 = vmul.f32 %v2432_v37, %v2432_v37 }
  0x21   : > { %v371_v27 = vsel %vm352_vm0, %v342_v23, 0.0  ;;  %v374_v33 = vsel %vm352_vm0, %v343_v30, 0.0  ;;  %v368_v34 = vsel %vm352_vm0, %v341_v31, 0.0  ;;  %v336_v41 = vmul.f32 %v2435_v38, %v2435_v38 }
  0x22   : > { %v365_v35 = vsel %vm352_vm0, %v340_v32, 0.0  ;;  %v359_v42 = vsel %vm352_vm0, %v338_v39, 0.0  ;;  %v362_v43 = vsel %vm352_vm0, %v339_v40, 0.0  ;;  %v337_v46 = vmul.f32 %v2446_v44, %v2446_v44 }
  0x23   : > { %v353_v45 = vsel %vm352_vm0, %v336_v41, 0.0 }
  0x24   : > { %v356_v47 = vsel %vm352_vm0, %v337_v46, 0.0 }
  0x26   : > { %399 = vadd.xlane.f32.xlu0 %v398_v15  ;;  %393 = vadd.xlane.f32.xlu1 %v392_v16 }
  0x27   : > { %387 = vadd.xlane.f32.xlu2 %v386_v17 }
  0x2e   : > { %378 = vadd.xlane.f32.xlu0 %v377_v24  ;;  %381 = vadd.xlane.f32.xlu1 %v380_v25 }
  0x2f   : > { %372 = vadd.xlane.f32.xlu2 %v371_v27 }
  0x36   : > { %375 = vadd.xlane.f32.xlu0 %v374_v33  ;;  %366 = vadd.xlane.f32.xlu1 %v365_v35 }
  0x37   : > { %369 = vadd.xlane.f32.xlu2 %v368_v34 }
  0x3e   : > { %360 = vadd.xlane.f32.xlu0 %v359_v42  ;;  %363 = vadd.xlane.f32.xlu1 %v362_v43 }
  0x3f   : > { %354 = vadd.xlane.f32.xlu2 %v353_v45 }
  0x46   : > { %357 = vadd.xlane.f32.xlu0 %v356_v47 }
  0x91   : > { %v397_v48 = vpop.xlane.xlu0 %396  ;;  %v391_v50 = vpop.xlane.xlu1 %390 }
  0x92   : > { %v415_v49 = vmax.f32 %v397_v48, 1e-24  ;;  %v385_v51 = vpop.xlane.xlu2 %384  ;;  %v413_v52 = vmax.f32 %v391_v50, 1e-24 }
  0x93   : > { %v411_v53 = vmax.f32 %v385_v51, 1e-24 }
  0x94   : > { %2009 = vrsqrt.f32 %v415_v49  ;;  %vm563_vm5 = vweird.f32 %v415_v49  ;;  %vm543_vm6 = vweird.f32 %v413_v52 }
  0x95   : > { %2011 = vrsqrt.f32 %v413_v52  ;;  %vm523_vm3 = vweird.f32 %v411_v53 }
  0x96   : > { %2013 = vrsqrt.f32 %v411_v53 }
  0x99   : > { %v400_v54 = vpop.xlane.xlu0 %399  ;;  %v394_v57 = vpop.xlane.xlu1 %393 }
  0x9a   : > { %v2010_v55 = vpop.eup %2009  ;;  %v2452_v56 = vmax.f32 %v400_v54, 1e-24  ;;  %v388_v58 = vpop.xlane.xlu2 %387  ;;  %v2454_v61 = vmax.f32 %v394_v57, 1e-24 }
  0x9b   : > { %v2012_v59 = vpop.eup %2011  ;;  %v558_v60 = vmul.f32 %v2010_v55, %v415_v49  ;;  %v2456_v62 = vmax.f32 %v388_v58, 1e-24  ;;  %vm564_vm2 = vweird.f32 %v2010_v55 }
  0x9c   : > { %v2014_v63 = vpop.eup %2013  ;;  %v538_v1 = vmul.f32 %v2012_v59, %v413_v52  ;;  %2015 = vrsqrt.f32 %v2452_v56  ;;  %vm544_vm7 = vweird.f32 %v2012_v59  ;;  %vm565_vm8 = vmor %vm563_vm5, %vm564_vm2  ;;  %vm573_vm9 = vweird.f32 %v2452_v56 }
  0x9d   : > { %v559_v4 = vmul.f32 %v2010_v55, %v558_v60  ;;  %v518_v5 = vmul.f32 %v2014_v63, %v411_v53  ;;  %2017 = vrsqrt.f32 %v2454_v61  ;;  %vm524_vm4 = vweird.f32 %v2014_v63  ;;  %vm545_vm13 = vmor %vm543_vm6, %vm544_vm7 }
  0x9e   : > { %v539_v7 = vmul.f32 %v2012_v59, %v538_v1  ;;  %2019 = vrsqrt.f32 %v2456_v62  ;;  %vm553_vm10 = vweird.f32 %v2454_v61  ;;  %vm2473_vm11 = vmor %vm523_vm3, %vm524_vm4  ;;  %vm533_vm2 = vweird.f32 %v2456_v62 }
  0x9f   : > { %v560_v10 = vmul.f32 0.5, %v559_v4  ;;  %v519_v11 = vmul.f32 %v2014_v63, %v518_v5 }
  0xa0   : > { %v540_v12 = vmul.f32 0.5, %v539_v7 }
  0xa1   : > { %v561_v13 = vsub.f32 1.5, %v560_v10  ;;  %v520_v14 = vmul.f32 0.5, %v519_v11  ;;  %v379_v15 = vpop.xlane.xlu0 %378  ;;  %v382_v21 = vpop.xlane.xlu1 %381 }
  0xa2   : > { %v2016_v16 = vpop.eup %2015  ;;  %v541_v17 = vsub.f32 1.5, %v540_v12  ;;  %v2467_v27 = vmax.f32 %v379_v15, 1e-24  ;;  %v2479_v34 = vmax.f32 %v382_v21, 1e-24  ;;  %v373_v47 = vpop.xlane.xlu2 %372 }
  0xa3   : > { %v2461_v22 = vpop.eup %2017  ;;  %v562_v23 = vmul.f32 %v2010_v55, %v561_v13  ;;  %v521_v24 = vsub.f32 1.5, %v520_v14  ;;  %v568_v25 = vmul.f32 %v2016_v16, %v2452_v56  ;;  %vm574_vm12 = vweird.f32 %v2016_v16 }
  0xa4   : > { %v2469_v30 = vpop.eup %2019  ;;  %v542_v31 = vmul.f32 %v2012_v59, %v541_v17  ;;  %v548_v33 = vmul.f32 %v2461_v22, %v2454_v61  ;;  %vm554_vm14 = vweird.f32 %v2461_v22  ;;  %vm575_vm15 = vmor %vm573_vm9, %vm574_vm12  ;;  %2021 = vrsqrt.f32 %v2479_v34 }
  0xa5   : > { %v566_v35 = vsel %vm565_vm8, %v2010_v55, %v562_v23  ;;  %v522_v39 = vmul.f32 %v2014_v63, %v521_v24  ;;  %v569_v40 = vmul.f32 %v2016_v16, %v568_v25  ;;  %v528_v41 = vmul.f32 %v2469_v30, %v2456_v62  ;;  %vm555_vm4 = vmor %vm553_vm10, %vm554_vm14 }
  0xa6   : > { %v591_v42 = vmul.f32 %v566_v35, %v2357_v0  ;;  %v640_v43 = vmul.f32 14.285714, %v566_v35  ;;  %v546_v45 = vsel %vm545_vm13, %v2012_v59, %v542_v31  ;;  %v549_v46 = vmul.f32 %v2461_v22, %v548_v33 }
  0xa7   : > { %v589_v48 = vmul.f32 %v546_v45, %v2362_v2  ;;  %v638_v49 = vmul.f32 14.285714, %v546_v45  ;;  %v526_v50 = vsel %vm2473_vm11, %v2014_v63, %v522_v39  ;;  %v570_v51 = vmul.f32 0.5, %v569_v40 }
  0xa8   : > { %v607_v52 = vpack.c.bf16 %v591_v42, %v591_v42  ;;  %v656_v53 = vmul.f32 %v640_v43, %v2357_v0  ;;  %v587_v54 = vmul.f32 %v526_v50, %v2365_v3  ;;  %v636_v55 = vmul.f32 14.285714, %v526_v50 }
  0xa9   : > { %v605_v57 = vpack.c.bf16 %v589_v48, %v589_v48  ;;  %v654_v58 = vmul.f32 %v638_v49, %v2362_v2  ;;  %v571_v59 = vsub.f32 1.5, %v570_v51  ;;  %v550_v60 = vmul.f32 0.5, %v549_v46  ;;  %v367_v7 = vpop.xlane.xlu1 %366 }
  0xaa   : > { %624 = vst.msk [vmem:[#allocation3 + $0x38] sm:$0xf] %vm609_vm1, %v607_v52  ;;  %v672_v1 = vpack.c.bf16 %v656_v53, %v656_v53  ;;  %v603_v4 = vpack.c.bf16 %v587_v54, %v587_v54  ;;  %v652_v5 = vmul.f32 %v636_v55, %v2365_v3  ;;  %v529_v63 = vmul.f32 %v2469_v30, %v528_v41  ;;  %v376_v3 = vpop.xlane.xlu0 %375  ;;  %v370_v61 = vpop.xlane.xlu2 %369 }
  0xab   : > { %622 = vst.msk [vmem:[#allocation3 + $0x30] sm:$0xf] %vm609_vm1, %v605_v57  ;;  %v670_v0 = vpack.c.bf16 %v654_v58, %v654_v58  ;;  %v572_v10 = vmul.f32 %v2016_v16, %v571_v59  ;;  %v551_v11 = vsub.f32 1.5, %v550_v60  ;;  %vm534_vm3 = vweird.f32 %v2469_v30 }
  0xac   : > { %688 = vst.msk [vmem:[#allocation2 + $0x38] sm:$0xf] %vm609_vm1, %v672_v1  ;;  %v668_v2 = vpack.c.bf16 %v652_v5, %v652_v5  ;;  %v530_v12 = vmul.f32 0.5, %v529_v63  ;;  %2023 = vrsqrt.f32 %v2467_v27  ;;  %v2516_v21 = vmax.f32 %v376_v3, 1e-24  ;;  %vm535_vm5 = vmor %vm533_vm2, %vm534_vm3 }
  0xad   : > { %686 = vst.msk [vmem:[#allocation2 + $0x30] sm:$0xf] %vm609_vm1, %v670_v0  ;;  %v576_v13 = vsel %vm575_vm15, %v2016_v16, %v572_v10  ;;  %v552_v14 = vmul.f32 %v2461_v22, %v551_v11  ;;  %v2518_v23 = vmax.f32 %v373_v47, 1e-24  ;;  %vm513_vm6 = vweird.f32 %v2479_v34 }
  0xae   : > { %620 = vst.msk [vmem:[#allocation3 + $0x28] sm:$0xf] %vm609_vm1, %v603_v4  ;;  %v592_v56 = vmul.f32 %v576_v13, %v2372_v6  ;;  %v641_v15 = vmul.f32 14.285714, %v576_v13  ;;  %v531_v17 = vsub.f32 1.5, %v530_v12  ;;  %2025 = vrsqrt.f32 %v2516_v21 }
  0xaf   : > { %684 = vst.msk [vmem:[#allocation2 + $0x28] sm:$0xf] %vm609_vm1, %v668_v2  ;;  %v556_v16 = vsel %vm555_vm4, %v2461_v22, %v552_v14  ;;  %v2022_v22 = vpop.eup %2021  ;;  %2027 = vrsqrt.f32 %v2518_v23  ;;  %v2534_v42 = vmax.f32 %v370_v61, 1e-24  ;;  %vm503_vm7 = vweird.f32 %v2467_v27 }
  0xb0   : > { %v608_v24 = vpack.c.bf16 %v592_v56, %v592_v56  ;;  %v657_v25 = vmul.f32 %v641_v15, %v2372_v6  ;;  %v590_v31 = vmul.f32 %v556_v16, %v2376_v8  ;;  %v639_v32 = vmul.f32 14.285714, %v556_v16 }
  0xb1   : > { %v532_v33 = vmul.f32 %v2469_v30, %v531_v17  ;;  %v508_v62 = vmul.f32 %v2022_v22, %v2479_v34  ;;  %vm493_vm8 = vweird.f32 %v2516_v21  ;;  %2029 = vrsqrt.f32 %v2534_v42 }
  0xb2   : > { %625 = vst.msk [vmem:[#allocation3 + $0x3c] sm:$0xf] %vm609_vm1, %v608_v24  ;;  %v673_v35 = vpack.c.bf16 %v657_v25, %v657_v25  ;;  %v606_v39 = vpack.c.bf16 %v590_v31, %v590_v31  ;;  %v655_v6 = vmul.f32 %v639_v32, %v2376_v8  ;;  %v2024_v40 = vpop.eup %2023  ;;  %v364_v8 = vpop.xlane.xlu1 %363  ;;  %v2545_v52 = vmax.f32 %v367_v7, 1e-24 }
  0xb3   : > { %v536_v41 = vsel %vm535_vm5, %v2469_v30, %v532_v33  ;;  %v498_v47 = vmul.f32 %v2024_v40, %v2467_v27  ;;  %v509_v48 = vmul.f32 %v2022_v22, %v508_v62  ;;  %v361_v30 = vpop.xlane.xlu0 %360  ;;  %vm514_vm9 = vweird.f32 %v2022_v22 }
  0xb4   : > { %689 = vst.msk [vmem:[#allocation2 + $0x3c] sm:$0xf] %vm609_vm1, %v673_v35  ;;  %v671_v43 = vpack.c.bf16 %v655_v6, %v655_v6  ;;  %v588_v45 = vmul.f32 %v536_v41, %v2379_v9  ;;  %v637_v46 = vmul.f32 14.285714, %v536_v41  ;;  %v2547_v53 = vpop.eup %2025  ;;  %vm504_vm10 = vweird.f32 %v2024_v40  ;;  %vm2566_vm12 = vmor %vm513_vm6, %vm514_vm9 }
  0xb5   : > { %623 = vst.msk [vmem:[#allocation3 + $0x34] sm:$0xf] %vm609_vm1, %v606_v39  ;;  %v499_v51 = vmul.f32 %v2024_v40, %v498_v47  ;;  %v510_v54 = vmul.f32 0.5, %v509_v48  ;;  %v2549_v55 = vmax.f32 %v364_v8, 1e-24  ;;  %v2551_v57 = vpop.eup %2027  ;;  %v488_v60 = vmul.f32 %v2547_v53, %v2516_v21  ;;  %vm505_vm15 = vmor %vm503_vm7, %vm504_vm10 }
  0xb6   : > { %687 = vst.msk [vmem:[#allocation2 + $0x34] sm:$0xf] %vm609_vm1, %v671_v43  ;;  %v604_v49 = vpack.c.bf16 %v588_v45, %v588_v45  ;;  %v653_v50 = vmul.f32 %v637_v46, %v2379_v9  ;;  %v2556_v9 = vmax.f32 %v361_v30, 1e-24  ;;  %v478_v4 = vmul.f32 %v2551_v57, %v2518_v23 }
  0xb7   : > { %v500_v59 = vmul.f32 0.5, %v499_v51  ;;  %v511_v1 = vsub.f32 1.5, %v510_v54  ;;  %vm483_vm11 = vweird.f32 %v2518_v23  ;;  %2031 = vrsqrt.f32 %v2545_v52  ;;  %v2573_v10 = vpop.eup %2029 }
  0xb8   : > { %621 = vst.msk [vmem:[#allocation3 + $0x2c] sm:$0xf] %vm609_vm1, %v604_v49  ;;  %v669_v58 = vpack.c.bf16 %v653_v50, %v653_v50  ;;  %v489_v0 = vmul.f32 %v2547_v53, %v488_v60  ;;  %vm494_vm13 = vweird.f32 %v2547_v53  ;;  %vm473_vm14 = vweird.f32 %v2534_v42 }
  0xb9   : > { %v1905_v5 = vld [vmem:[#allocation3 + $0x38] sm:$0xff]  ;;  %v501_v7 = vsub.f32 1.5, %v500_v59  ;;  %v512_v11 = vmul.f32 %v2022_v22, %v511_v1  ;;  %v479_v34 = vmul.f32 %v2551_v57, %v478_v4  ;;  %vm484_vm2 = vweird.f32 %v2551_v57  ;;  %vm2597_vm5 = vmor %vm493_vm8, %vm494_vm13 }
  0xba   : > { %685 = vst.msk [vmem:[#allocation2 + $0x2c] sm:$0xf] %vm609_vm1, %v669_v58  ;;  %2033 = vrsqrt.f32 %v2549_v55  ;;  %v490_v12 = vmul.f32 0.5, %v489_v0  ;;  %v468_v3 = vmul.f32 %v2573_v10, %v2534_v42  ;;  %vm463_vm3 = vweird.f32 %v2545_v52  ;;  %vm2608_vm6 = vmor %vm483_vm11, %vm484_vm2 }
  0xbb   : > { %v502_v2 = vmul.f32 %v2024_v40, %v501_v7  ;;  %2035 = vrsqrt.f32 %v2556_v9  ;;  %v516_v13 = vsel %vm2566_vm12, %v2022_v22, %v512_v11  ;;  %v480_v27 = vmul.f32 0.5, %v479_v34  ;;  %v358_v60 = vpop.xlane.xlu0 %357 }
  0xbc   : > { %vm474_vm4 = vweird.f32 %v2573_v10  ;;  %v891_v14 = vsel %vm352_vm0, %v1905_v5, 0  ;;  %v586_v56 = vmul.f32 %v516_v13, %v2396_v19  ;;  %v635_v15 = vmul.f32 14.285714, %v516_v13 }
  0xbd   : > { %v506_v17 = vsel %vm505_vm15, %v2024_v40, %v502_v2  ;;  %v491_v16 = vsub.f32 1.5, %v490_v12  ;;  %893 = vmatpush.bf16.xpose.msra.mxu0 %v891_v14  ;;  %1914 = vmatpush.bf16.xpose.msra.mxu1 %v891_v14  ;;  %v2590_v24 = vpop.eup %2031  ;;  %v481_v61 = vsub.f32 1.5, %v480_v27  ;;  %v469_v33 = vmul.f32 %v2573_v10, %v468_v3  ;;  %vm2639_vm8 = vmor %vm473_vm14, %vm474_vm4 }
  0xbe   : > { %v585_v25 = vmul.f32 %v506_v17, %v2393_v18  ;;  %v634_v31 = vmul.f32 14.285714, %v506_v17  ;;  %1915 = vmatpush.bf16.xpose.msra.mxu2 %v891_v14  ;;  %1916 = vmatpush.bf16.xpose.msra.mxu3 %v891_v14  ;;  %v602_v22 = vpack.c.bf16 %v586_v56, %v586_v56  ;;  %v651_v35 = vmul.f32 %v635_v15, %v2396_v19  ;;  %v1904_v14 = vld [vmem:[#allocation3 + $0x30] sm:$0xff] }
  0xbf   : > { %v492_v39 = vmul.f32 %v2547_v53, %v491_v16  ;;  %v458_v6 = vmul.f32 %v2590_v24, %v2545_v52  ;;  %v482_v19 = vmul.f32 %v2551_v57, %v481_v61  ;;  %v470_v43 = vmul.f32 0.5, %v469_v33 }
  0xc0   : > { %v2614_v40 = vpop.eup %2033  ;;  %v601_v41 = vpack.c.bf16 %v585_v25, %v585_v25  ;;  %v650_v62 = vmul.f32 %v634_v31, %v2393_v18  ;;  %619 = vst.msk [vmem:[#allocation3 + $0x24] sm:$0xf] %vm609_vm1, %v602_v22  ;;  %v667_v23 = vpack.c.bf16 %v651_v35, %v651_v35  ;;  %vm464_vm7 = vweird.f32 %v2590_v24 }
  0xc1   : > { %v2618_v45 = vpop.eup %2035  ;;  %v496_v46 = vsel %vm2597_vm5, %v2547_v53, %v492_v39  ;;  %v459_v47 = vmul.f32 %v2590_v24, %v458_v6  ;;  %v486_v30 = vsel %vm2608_vm6, %v2551_v57, %v482_v19  ;;  %v471_v51 = vsub.f32 1.5, %v470_v43  ;;  %vm2653_vm10 = vmor %vm463_vm3, %vm464_vm7  ;;  %v943_v39 = vld [vmem:[%s2686_s27] sm:$0xff] }
  0xc2   : > { %618 = vst.msk [vmem:[#allocation3 + $0x20] sm:$0xf] %vm609_vm1, %v601_v41  ;;  %v666_v8 = vpack.c.bf16 %v650_v62, %v650_v62  ;;  %v584_v18 = vmul.f32 %v496_v46, %v2410_v26  ;;  %v633_v48 = vmul.f32 14.285714, %v496_v46  ;;  %v583_v49 = vmul.f32 %v486_v30, %v2399_v20 }
  0xc3   : > { %683 = vst.msk [vmem:[#allocation2 + $0x24] sm:$0xf] %vm609_vm1, %v667_v23  ;;  %v632_v50 = vmul.f32 14.285714, %v486_v30  ;;  %v460_v53 = vmul.f32 0.5, %v459_v47  ;;  %v448_v57 = vmul.f32 %v2614_v40, %v2549_v55  ;;  %vm453_vm9 = vweird.f32 %v2549_v55  ;;  %v1903_v23 = vld [vmem:[#allocation3 + $0x28] sm:$0xff] }
  0xc4   : > { %682 = vst.msk [vmem:[#allocation2 + $0x20] sm:$0xf] %vm609_vm1, %v666_v8  ;;  %v600_v54 = vpack.c.bf16 %v584_v18, %v584_v18  ;;  %v649_v58 = vmul.f32 %v633_v48, %v2410_v26  ;;  %v599_v1 = vpack.c.bf16 %v583_v49, %v583_v49  ;;  %v472_v5 = vmul.f32 %v2573_v10, %v471_v51 }
  0xc5   : > { %v648_v4 = vmul.f32 %v632_v50, %v2399_v20  ;;  %v461_v26 = vsub.f32 1.5, %v460_v53  ;;  %v449_v7 = vmul.f32 %v2614_v40, %v448_v57  ;;  %v438_v0 = vmul.f32 %v2618_v45, %v2556_v9  ;;  %v355_v20 = vpop.xlane.xlu2 %354 }
  0xc6   : > { %617 = vst.msk [vmem:[#allocation3 + $0x1c] sm:$0xf] %vm609_vm1, %v600_v54  ;;  %v665_v63 = vpack.c.bf16 %v649_v58, %v649_v58  ;;  %vm443_vm11 = vweird.f32 %v2556_v9  ;;  %v476_v34 = vsel %vm2639_vm8, %v2573_v10, %v472_v5  ;;  %v2666_v2 = vmax.f32 %v358_v60, 1e-24 }
  0xc7   : > { %616 = vst.msk [vmem:[#allocation3 + $0x18] sm:$0xf] %vm609_vm1, %v599_v1  ;;  %v664_v11 = vpack.c.bf16 %v648_v4, %v648_v4  ;;  %v462_v52 = vmul.f32 %v2590_v24, %v461_v26  ;;  %v582_v12 = vmul.f32 %v476_v34, %v2414_v28  ;;  %v631_v3 = vmul.f32 14.285714, %v476_v34 }
  0xc8   : > { %681 = vst.msk [vmem:[#allocation2 + $0x1c] sm:$0xf] %vm609_vm1, %v665_v63  ;;  %v450_v13 = vmul.f32 0.5, %v449_v7  ;;  %v439_v27 = vmul.f32 %v2618_v45, %v438_v0  ;;  %vm454_vm12 = vweird.f32 %v2614_v40  ;;  %2037 = vrsqrt.f32 %v2666_v2 }
  0xc9   : > { %680 = vst.msk [vmem:[#allocation2 + $0x18] sm:$0xf] %vm609_vm1, %v664_v11  ;;  %v466_v10 = vsel %vm2653_vm10, %v2590_v24, %v462_v52  ;;  %v2677_v56 = vmax.f32 %v355_v20, 1e-24  ;;  %v598_v15 = vpack.c.bf16 %v582_v12, %v582_v12  ;;  %v647_v17 = vmul.f32 %v631_v3, %v2414_v28  ;;  %vm455_vm14 = vmor %vm453_vm9, %vm454_vm12  ;;  %v949_v20 = vld [vmem:[%s2686_s27 + $0x30] sm:$0xff] }
  0xca   : > { %v581_v16 = vmul.f32 %v466_v10, %v2417_v29  ;;  %v630_v25 = vmul.f32 14.285714, %v466_v10  ;;  %v451_v24 = vsub.f32 1.5, %v450_v13  ;;  %v440_v31 = vmul.f32 0.5, %v439_v27  ;;  %v951_v10 = vld [vmem:[%s2686_s27 + $0x40] sm:$0xff] }
  0xcb   : > { %vm444_vm13 = vweird.f32 %v2618_v45  ;;  %2039 = vrsqrt.f32 %v2677_v56  ;;  %615 = vst.msk [vmem:[#allocation3 + $0x14] sm:$0xf] %vm609_vm1, %v598_v15  ;;  %v663_v32 = vpack.c.bf16 %v647_v17, %v647_v17  ;;  %v888_v33 = vsel %vm352_vm0, %v1904_v14, 0  ;;  %v944_v15 = vld [vmem:[%s2686_s27 + $0x8] sm:$0xff] }
  0xcc   : > { %v597_v28 = vpack.c.bf16 %v581_v16, %v581_v16  ;;  %v646_v61 = vmul.f32 %v630_v25, %v2417_v29  ;;  %v452_v22 = vmul.f32 %v2614_v40, %v451_v24  ;;  %v441_v35 = vsub.f32 1.5, %v440_v31  ;;  %894 = vmatpush.bf16.xpose.msra.mxu0 %v888_v33  ;;  %1917 = vmatpush.bf16.xpose.msra.mxu1 %v888_v33  ;;  %vm2704_vm15 = vmor %vm443_vm11, %vm444_vm13  ;;  %v954_v16 = vld [vmem:[%s2686_s27 + $0x58] sm:$0xff]  ;;  %v957_v31 = vld [vmem:[%s2686_s27 + $0x70] sm:$0xff] }
  0xcd   : > { %679 = vst.msk [vmem:[#allocation2 + $0x14] sm:$0xf] %vm609_vm1, %v663_v32  ;;  %1918 = vmatpush.bf16.xpose.msra.mxu2 %v888_v33  ;;  %1919 = vmatpush.bf16.xpose.msra.mxu3 %v888_v33  ;;  %v2249_v62 = vmov 0   ;;  %v885_v54 = vsel %vm352_vm0, %v1903_v23, 0  ;;  %vm433_vm2 = vweird.f32 %v2666_v2  ;;  %vm423_vm4 = vweird.f32 %v2677_v56  ;;  %v952_v32 = vld [vmem:[%s2686_s27 + $0x48] sm:$0xff]  ;;  %v1910_v29 = vld [vmem:[#allocation2 + $0x20] sm:$0xff] }
  0xce   : > { %v662_v21 = vpack.c.bf16 %v646_v61, %v646_v61  ;;  %v2038_v55 = vpop.eup %2037  ;;  %614 = vst.msk [vmem:[#allocation3 + $0x10] sm:$0xf] %vm609_vm1, %v597_v28  ;;  %v456_v6 = vsel %vm455_vm14, %v2614_v40, %v452_v22  ;;  %v442_v41 = vmul.f32 %v2618_v45, %v441_v35  ;;  %2004 = vset.pattern.permute.xlu1 %v2249_v62  ;;  %v1901_v27 = vld [vmem:[#allocation3 + $0x18] sm:$0xff]  ;;  %v955_v22 = vld [vmem:[%s2686_s27 + $0x60] sm:$0xff]  ;;  %v948_v35 = vld [vmem:[%s2686_s27 + $0x28] sm:$0xff] }
  0xcf   : > { %2006 = vset.pattern.permute.xlu0 %v2249_v62  ;;  %v580_v9 = vmul.f32 %v456_v6, %v2432_v37  ;;  %v629_v19 = vmul.f32 14.285714, %v456_v6  ;;  %v428_v43 = vmul.f32 %v2038_v55, %v2666_v2  ;;  %982 = vperm.xlu1 %2004, %v943_v39   ;;  %vm434_vm3 = vweird.f32 %v2038_v55  ;;  %v946_v28 = vld [vmem:[%s2686_s27 + $0x18] sm:$0xff] }
  0xd0   : > { %678 = vst.msk [vmem:[#allocation2 + $0x10] sm:$0xf] %vm609_vm1, %v662_v21  ;;  %2005 = vset.pattern.permute.xlu2 %v2249_v62  ;;  %v446_v40 = vsel %vm2704_vm15, %v2618_v45, %v442_v41  ;;  %v947_v45 = vld [vmem:[%s2686_s27 + $0x20] sm:$0xff]  ;;  %vm435_vm6 = vmor %vm433_vm2, %vm434_vm3  ;;  %v950_v6 = vld [vmem:[%s2686_s27 + $0x38] sm:$0xff] }
  0xd1   : > { %v2040_v46 = vpop.eup %2039  ;;  %v596_v47 = vpack.c.bf16 %v580_v9, %v580_v9  ;;  %v645_v8 = vmul.f32 %v629_v19, %v2432_v37  ;;  %v579_v18 = vmul.f32 %v446_v40, %v2429_v36  ;;  %v628_v48 = vmul.f32 14.285714, %v446_v40  ;;  %985 = vperm.xlu2 %2005, %v944_v15   ;;  %v958_v41 = vld [vmem:[%s2686_s27 + $0x78] sm:$0xff]  ;;  %v953_v62 = vld [vmem:[%s2686_s27 + $0x50] sm:$0xff] }
  0xd2   : > { %v429_v30 = vmul.f32 %v2038_v55, %v428_v43  ;;  %v418_v49 = vmul.f32 %v2040_v46, %v2677_v56  ;;  %vm424_vm5 = vweird.f32 %v2040_v46  ;;  %v945_v56 = vld [vmem:[%s2686_s27 + $0x10] sm:$0xff]  ;;  %v1909_v19 = vld [vmem:[#allocation2 + $0x18] sm:$0xff]  ;;  %v1911_v43 = vld [vmem:[#allocation2 + $0x28] sm:$0xff]  ;;  %v960_v40 = vlaneseq }
  0xd3   : > { %613 = vst.msk [vmem:[#allocation3 + $0xc] sm:$0xf] %vm609_vm1, %v596_v47  ;;  %v661_v50 = vpack.c.bf16 %v645_v8, %v645_v8  ;;  %v595_v51 = vpack.c.bf16 %v579_v18, %v579_v18  ;;  %v644_v53 = vmul.f32 %v628_v48, %v2429_v36  ;;  %v1902_v36 = vld [vmem:[#allocation3 + $0x20] sm:$0xff]  ;;  %vm425_vm7 = vmor %vm423_vm4, %vm424_vm5  ;;  %988 = vperm.xlu0 %2006, %v945_v56   ;;  %v1913_v23 = vld [vmem:[#allocation2 + $0x38] sm:$0xff] }
  0xd4   : > { %v430_v58 = vmul.f32 0.5, %v429_v30  ;;  %v419_v37 = vmul.f32 %v2040_v46, %v418_v49  ;;  %895 = vmatpush.bf16.xpose.msra.mxu0 %v885_v54  ;;  %1920 = vmatpush.bf16.xpose.msra.mxu1 %v885_v54  ;;  %v882_v7 = vsel %vm352_vm0, %v1902_v36, 0  ;;  %v2767_v47 = vshrl.u32 %v960_v40, 7 }
  0xd5   : > { %677 = vst.msk [vmem:[#allocation2 + $0xc] sm:$0xf] %vm609_vm1, %v661_v50  ;;  %v660_v59 = vpack.c.bf16 %v644_v53, %v644_v53  ;;  %1921 = vmatpush.bf16.xpose.msra.mxu2 %v885_v54  ;;  %1922 = vmatpush.bf16.xpose.msra.mxu3 %v885_v54  ;;  %v2769_v8 = vand.u32 127, %v960_v40 }
  0xd6   : > { %612 = vst.msk [vmem:[#allocation3 + $0x8] sm:$0xf] %vm609_vm1, %v595_v51  ;;  %v431_v57 = vsub.f32 1.5, %v430_v58  ;;  %v420_v60 = vmul.f32 0.5, %v419_v37  ;;  %v2772_v18 = vadd.s32 88, %v2767_v47  ;;  %v2775_v48 = vadd.s32 112, %v2767_v47 }
  0xd7   : > { %676 = vst.msk [vmem:[#allocation2 + $0x8] sm:$0xf] %vm609_vm1, %v660_v59  ;;  %994 = vperm.xlu1 %2004, %v947_v45   ;;  %v1908_v21 = vld [vmem:[#allocation2 + $0x10] sm:$0xff]  ;;  %vm1046_vm10 = vcmp.ne.s32.totalorder %v2767_v47, %v2769_v8 }
  0xd8   : > { %v432_v1 = vmul.f32 %v2038_v55, %v431_v57  ;;  %v421_v4 = vsub.f32 1.5, %v420_v60  ;;  %vm1060_vm8 = vcmp.ne.s32.totalorder %v2775_v48, %v2769_v8  ;;  %v2790_v57 = vld [vmem:[%s309_s11] ss:$0 sm:$0xff]  ;;  %s1780_s11 = sshll.u32 %s3271_s7, 3 }
  0xd9   : > { %991 = vperm.xlu2 %2005, %v946_v28   ;;  %s293_s16 = scalar_lea.vmem [#allocation8], %s1780_s11  ;;  %s286_s29 = scalar_lea.vmem [#allocation6], %s1780_s11 }
  0xda   : > { %v436_v5 = vsel %vm435_vm6, %v2038_v55, %v432_v1  ;;  %v422_v26 = vmul.f32 %v2040_v46, %v421_v4  ;;  %v1912_v55 = vld [vmem:[#allocation2 + $0x30] sm:$0xff]  ;;  %v2795_v1 = vadd.s32 120, %v2767_v47  ;;  %v2802_v4 = vld [vmem:[%s315_s17] ss:$0 sm:$0xff]  ;;  %s1634_s17 = sshll.u32 %s293_s16, 4  ;;  %s1620_s8 = sshll.u32 %s286_s29, 4  ;;  %s3281_s17 = int_to_ptr.vmem [resolvable:$true] %s1634_s17  ;;  %s1621_s8 = int_to_ptr.vmem [resolvable:$true] %s1620_s8 }
  0xdb   : > { %v578_v63 = vmul.f32 %v436_v5, %v2446_v44  ;;  %v627_v42 = vmul.f32 14.285714, %v436_v5  ;;  %1009 = vperm.xlu0 %2006, %v952_v32   ;;  %v970_v32 = vadd.s32 72, %v2767_v47  ;;  %s2153_s11 = scalar_lea.hbm %s2152_s24, 8 }
  0xdc   : > { %v426_v0 = vsel %vm425_vm7, %v2040_v46, %v422_v26  ;;  %896 = vmatpush.bf16.xpose.msra.mxu0 %v882_v7  ;;  %1923 = vmatpush.bf16.xpose.msra.mxu1 %v882_v7  ;;  %v956_v46 = vld [vmem:[%s2686_s27 + $0x68] sm:$0xff]  ;;  %s1632_s27 = scalar_lea.hbm %s3337_s5, %s1892_s12  ;;  %p2154_p12 = scmp.ne.s32.totalorder %s2152_s24, %s2153_s11 }
  0xdd   : > { %v594_v11 = vpack.c.bf16 %v578_v63, %v578_v63  ;;  %v643_v34 = vmul.f32 %v627_v42, %v2446_v44  ;;  %v577_v52 = vmul.f32 %v426_v0, %v2435_v38  ;;  %v626_v2 = vmul.f32 14.285714, %v426_v0  ;;  %1924 = vmatpush.bf16.xpose.msra.mxu2 %v882_v7  ;;  %1925 = vmatpush.bf16.xpose.msra.mxu3 %v882_v7  ;;  %v1899_v25 = vld [vmem:[#allocation3 + $0x8] sm:$0xff]  ;;  %s1636_s10 = sshll.u32 %s1632_s27, 4  ;;  %p2159_p2 = scmp.lt.s32.totalorder %s2157_s25, %s2153_s11  ;;  %s3283_s10 = int_to_ptr.hbm [resolvable:$true] %s1636_s10 }
  0xde   : > { %v879_v44 = vsel %vm352_vm0, %v1901_v27, 0  ;;  %v873_v24 = vsel %vm352_vm0, %v1899_v25, 0  ;;  %v1907_v9 = vld [vmem:[#allocation2 + $0x8] sm:$0xff]  ;;  %vm1055_vm5 = vcmp.ne.s32.totalorder %v970_v32, %v2769_v8  ;;  %p2155_p13 = pnand %p2154_p12, %p2321_p4 }
  0xdf   : > { %611 = vst.msk [vmem:[#allocation3 + $0x4] sm:$0xf] %vm609_vm1, %v594_v11  ;;  %v659_v12 = vpack.c.bf16 %v643_v34, %v643_v34  ;;  %v593_v3 = vpack.c.bf16 %v577_v52, %v577_v52  ;;  %v642_v13 = vmul.f32 %v626_v2, %v2435_v38  ;;  %1000 = vperm.xlu1 %2004, %v949_v20   ;;  %v1900_v38 = vld [vmem:[#allocation3 + $0x10] sm:$0xff]  ;;  %v969_v2 = vadd.s32 64, %v2767_v47  ;;  %p2160_p3 = por %p2159_p2, %p2158_p1 }
  0xe0   : > { %v876_v17 = vsel %vm352_vm0, %v1900_v38, 0  ;;  %p2156_p0 = pneg %p2155_p13 }
  0xe1   : > { %675 = vst.msk [vmem:[#allocation2 + $0x4] sm:$0xf] %vm609_vm1, %v659_v12  ;;  %v658_v14 = vpack.c.bf16 %v642_v13, %v642_v13  ;;  %997 = vperm.xlu2 %2005, %v948_v35   ;;  %v965_v13 = vadd.s32 32, %v2767_v47  ;;  %vm1054_vm13 = vcmp.ne.s32.totalorder %v969_v2, %v2769_v8  ;;  %v962_v35 = vadd.s32 8, %v2767_v47 }
  0xe2   : > { %610 = vst.msk [vmem:[#allocation3] sm:$0xf] %vm609_vm1, %v593_v3  ;;  %p2161_p5 = pnand %p2160_p3, %p2156_p0 }
  0xe3   : > { %674 = vst.msk [vmem:[#allocation2] sm:$0xf] %vm609_vm1, %v658_v14  ;;  %1018 = vperm.xlu0 %2006, %v955_v22   ;;  %vm1057_vm1 = vcmp.ne.s32.totalorder %v2772_v18, %v2769_v8  ;;  %vm1050_vm15 = vcmp.ne.s32.totalorder %v965_v13, %v2769_v8  ;;  %vm1047_vm7 = vcmp.ne.s32.totalorder %v962_v35, %v2769_v8 }
  0xe4   : > { %897 = vmatpush.bf16.xpose.msra.mxu0 %v879_v44  ;;  %1926 = vmatpush.bf16.xpose.msra.mxu1 %v879_v44 }
  0xe5   : > { %1927 = vmatpush.bf16.xpose.msra.mxu2 %v879_v44  ;;  %1928 = vmatpush.bf16.xpose.msra.mxu3 %v879_v44 }
  0xe7   : > { %1006 = vperm.xlu1 %2004, %v951_v10  }
  0xe9   : > { %v1898_v61 = vld [vmem:[#allocation3] sm:$0xff]  ;;  %1003 = vperm.xlu2 %2005, %v950_v6  }
  0xea   : > { %v870_v33 = vsel %vm352_vm0, %v1898_v61, 0  ;;  %v1906_v39 = vld [vmem:[#allocation2] sm:$0xff] }
  0xeb   : > { %1027 = vperm.xlu0 %2006, %v958_v41  }
  0xec   : > { %898 = vmatpush.bf16.xpose.msra.mxu0 %v876_v17  ;;  %1929 = vmatpush.bf16.xpose.msra.mxu1 %v876_v17 }
  0xed   : > { %1930 = vmatpush.bf16.xpose.msra.mxu2 %v876_v17  ;;  %1931 = vmatpush.bf16.xpose.msra.mxu3 %v876_v17 }
  0xef   : > { %1015 = vperm.xlu1 %2004, %v954_v16  }
  0xf1   : > { %1012 = vperm.xlu2 %2005, %v953_v62  }
  0xf4   : > { %899 = vmatpush.bf16.xpose.msra.mxu0 %v873_v24  ;;  %1932 = vmatpush.bf16.xpose.msra.mxu1 %v873_v24 }
  0xf5   : > { %1933 = vmatpush.bf16.xpose.msra.mxu2 %v873_v24  ;;  %1934 = vmatpush.bf16.xpose.msra.mxu3 %v873_v24 }
  0xf7   : > { %1024 = vperm.xlu1 %2004, %v957_v31  }
  0xf9   : > { %1021 = vperm.xlu2 %2005, %v956_v46  }
  0xfc   : > { %900 = vmatpush.bf16.xpose.msra.mxu0 %v870_v33  ;;  %1935 = vmatpush.bf16.xpose.msra.mxu1 %v870_v33 }
  0xfd   : > { %1936 = vmatpush.bf16.xpose.msra.mxu2 %v870_v33  ;;  %1937 = vmatpush.bf16.xpose.msra.mxu3 %v870_v33 }
 0x103   : > { %1850 = vmatmul.msk.bf16.vlgmr.msra.gmra.mxu0 %vm352_vm0, %v1906_v39  ;;  %1852 = vmatmul.msk.bf16.vlgmr.msra.gmra.mxu1 %vm352_vm0, %v1908_v21 }
 0x104   : > { %1854 = vmatmul.msk.bf16.vlgmr.msra.gmra.mxu2 %vm352_vm0, %v1910_v29  ;;  %1856 = vmatmul.msk.bf16.vlgmr.msra.gmra.mxu3 %vm352_vm0, %v1912_v55 }
 0x113   : > { %1851 = vmatmul.msk.bf16.gmra.mxu0 %vm352_vm0, %v1907_v9  ;;  %1853 = vmatmul.msk.bf16.gmra.mxu1 %vm352_vm0, %v1909_v19 }
 0x114   : > { %1855 = vmatmul.msk.bf16.gmra.mxu2 %vm352_vm0, %v1911_v43  ;;  %1857 = vmatmul.msk.bf16.gmra.mxu3 %vm352_vm0, %v1913_v23  ;;  %vm1061_vm0 = vcmp.ne.s32.totalorder %v2795_v1, %v2769_v8  ;;  %v963_v1 = vadd.s32 16, %v2767_v47 }
 0x12b   : > { %v2783_v45 = vpop.permute.xlu2 %985 }
 0x12c   : > { %vm1031_vm6 = vcmp.eq.s32.totalorder %v2783_v45, %v2790_v57  ;;  %v966_v45 = vadd.s32 40, %v2767_v47 }
 0x133   : > { %v2813_v12 = vpop.permute.xlu2 %991 }
 0x13b   : > { %v998_v6 = vpop.permute.xlu2 %997 }
 0x141   : > { %v983_v30 = vpop.permute.xlu1 %982 }
 0x142   : > { %vm1030_vm9 = vcmp.eq.s32.totalorder %v983_v30, %v2790_v57 }
 0x143   : > { %vm1062_vm11 = vmand %vm1030_vm9, %vm1046_vm10  ;;  %v1004_v2 = vpop.permute.xlu2 %1003 }
 0x144   : > { %vm1063_vm10 = vmand %vm1031_vm6, %vm1047_vm7 }
 0x145   : > { %v2807_v0 = vpop.permute.xlu0 %988 }
 0x149   : > { %v995_v49 = vpop.permute.xlu1 %994 }
 0x14a   : > { %vm1034_vm14 = vcmp.eq.s32.totalorder %v995_v49, %v2790_v57 }
 0x14b   : > { %vm1066_vm3 = vmand %vm1034_vm14, %vm1050_vm15  ;;  %vm1051_vm14 = vcmp.ne.s32.totalorder %v966_v45, %v2769_v8 }
 0x14d   : > { %v1010_v61 = vpop.permute.xlu0 %1009 }
 0x14e   : > { %vm1039_vm4 = vcmp.eq.s32.totalorder %v1010_v61, %v2790_v57 }
 0x14f   : > { %vm2838_vm9 = vmand %vm1039_vm4, %vm1055_vm5 }
 0x151   : > { %v2781_v50 = vpop.permute.xlu1 %1000 }
 0x159   : > { %v1007_v7 = vpop.permute.xlu1 %1006 }
 0x15a   : > { %vm1038_vm12 = vcmp.eq.s32.totalorder %v1007_v7, %v2790_v57 }
 0x15b   : > { %vm1070_vm2 = vmand %vm1038_vm12, %vm1054_vm13  ;;  %vm1035_vm13 = vcmp.eq.s32.totalorder %v998_v6, %v2790_v57 }
 0x15c   : > { %vm1067_vm4 = vmand %vm1035_vm13, %vm1051_vm14 }
 0x161   : > { %v2825_v28 = vpop.permute.xlu1 %1015 }
 0x180   : > { %v902_v51 = vpop.f32.mrf.mxu0  ;;  %v912_v53 = vpop.f32.mrf.mxu1 }
 0x181   : > { %v1858_v54 = vadd.f32 -14.285714, %v902_v51  ;;  %v1862_v58 = vadd.f32 -14.285714, %v912_v53  ;;  %v967_v53 = vadd.s32 48, %v2767_v47 }
 0x183   : > { %v1094_v37 = vmul.f32 1.442695, %v1858_v54  ;;  %v1102_v59 = vmul.f32 1.442695, %v1862_v58  ;;  %vm1052_vm12 = vcmp.ne.s32.totalorder %v967_v53, %v2769_v8 }
 0x185   : > { %2041 = vpow2.f32 %v1094_v37 }
 0x186   : > { %2043 = vpow2.f32 %v1102_v59 }
 0x187   : > { %v922_v60 = vpop.f32.mrf.mxu2  ;;  %v2792_v36 = vpop.f32.mrf.mxu3 }
 0x188   : > { %v1866_v5 = vadd.f32 -14.285714, %v922_v60  ;;  %v904_v26 = vpop.f32.mrf.mxu0  ;;  %v914_v63 = vpop.f32.mrf.mxu1 }
 0x189   : > { %v1859_v42 = vadd.f32 -14.285714, %v904_v26  ;;  %v1863_v14 = vadd.f32 -14.285714, %v914_v63  ;;  %v1025_v60 = vpop.permute.xlu1 %1024 }
 0x18a   : > { %v1110_v20 = vmul.f32 1.442695, %v1866_v5  ;;  %v2850_v5 = vpop.permute.xlu0 %1018  ;;  %vm1044_vm15 = vcmp.eq.s32.totalorder %v1025_v60, %v2790_v57 }
 0x18b   : > { %v2042_v11 = vpop.eup %2041  ;;  %v1096_v34 = vmul.f32 1.442695, %v1859_v42  ;;  %v1104_v24 = vmul.f32 1.442695, %v1863_v14  ;;  %vm2874_vm6 = vmand %vm1044_vm15, %vm1060_vm8  ;;  %vm1041_vm8 = vcmp.eq.s32.totalorder %v2825_v28, %v2790_v57 }
 0x18c   : > { %2045 = vpow2.f32 %v1110_v20  ;;  %v1129_v52 = vmul.f32 %v2042_v11, %v2802_v4  ;;  %v2044_v27 = vpop.eup %2043  ;;  %v968_v11 = vadd.s32 56, %v2767_v47 }
 0x18d   : > { %2047 = vpow2.f32 %v1096_v34  ;;  %v1133_v25 = vmul.f32 %v2044_v27, %v2802_v4 }
 0x18e   : > { %1161 = vadd.xlane.f32.xlu0 %v1129_v52  ;;  %v1242_v3 = vsel %vm1062_vm11, %v1129_v52, 0.0  ;;  %vm1036_vm11 = vcmp.eq.s32.totalorder %v2781_v50, %v2790_v57  ;;  %vm1053_vm5 = vcmp.ne.s32.totalorder %v968_v11, %v2769_v8 }
 0x18f   : > { %v924_v44 = vpop.f32.mrf.mxu2  ;;  %v2816_v10 = vpop.f32.mrf.mxu3  ;;  %1258 = vadd.xlane.f32.xlu2 %v1242_v3  ;;  %v1246_v21 = vsel %vm1066_vm3, %v1133_v25, 0.0  ;;  %vm1068_vm3 = vmand %vm1036_vm11, %vm1052_vm12  ;;  %vm1033_vm12 = vcmp.eq.s32.totalorder %v2813_v12, %v2790_v57 }
 0x190   : > { %v1867_v56 = vadd.f32 -14.285714, %v924_v44  ;;  %v917_v15 = vpop.f32.mrf.mxu1  ;;  %v907_v40 = vpop.f32.mrf.mxu0 }
 0x191   : > { %v1864_v38 = vadd.f32 -14.285714, %v917_v15  ;;  %v1860_v14 = vadd.f32 -14.285714, %v907_v40 }
 0x192   : > { %v2046_v17 = vpop.eup %2045  ;;  %v1112_v16 = vmul.f32 1.442695, %v1867_v56 }
 0x193   : > { %v1137_v31 = vmul.f32 %v2046_v17, %v2802_v4  ;;  %v1106_v33 = vmul.f32 1.442695, %v1864_v38  ;;  %v2048_v39 = vpop.eup %2047 }
 0x194   : > { %2049 = vpow2.f32 %v1112_v16  ;;  %v1130_v19 = vmul.f32 %v2048_v39, %v2802_v4 }
 0x195   : > { %v1250_v22 = vsel %vm1070_vm2, %v1137_v31, 0.0  ;;  %2051 = vpow2.f32 %v1104_v24  ;;  %vm1037_vm2 = vcmp.eq.s32.totalorder %v1004_v2, %v2790_v57  ;;  %v1028_v24 = vpop.permute.xlu0 %1027 }
 0x196   : > { %1274 = vadd.xlane.f32.xlu1 %v1250_v22  ;;  %1169 = vadd.xlane.f32.xlu0 %v1133_v25  ;;  %2053 = vpow2.f32 %v1106_v33  ;;  %v1243_v58 = vsel %vm1063_vm10, %v1130_v19, 0.0  ;;  %vm2886_vm7 = vmand %vm1037_vm2, %vm1053_vm5  ;;  %vm1042_vm5 = vcmp.eq.s32.totalorder %v2850_v5, %v2790_v57  ;;  %v2250_v5 = vmov 0.0  }
 0x197   : > { %v927_v29 = vpop.f32.mrf.mxu2  ;;  %v937_v55 = vpop.f32.mrf.mxu3  ;;  %1266 = vadd.xlane.f32.xlu2 %v1246_v21  ;;  %vm2903_vm10 = vmand %vm1041_vm8, %vm1057_vm1  ;;  %vm1032_vm1 = vcmp.eq.s32.totalorder %v2807_v0, %v2790_v57 }
 0x198   : > { %v1872_v41 = vadd.f32 -14.285714, %v937_v55  ;;  %v919_v62 = vpop.f32.mrf.mxu1  ;;  %v1868_v30 = vadd.f32 -14.285714, %v927_v29  ;;  %v909_v15 = vpop.f32.mrf.mxu0 }
 0x199   : > { %v1865_v9 = vadd.f32 -14.285714, %v919_v62  ;;  %v1861_v32 = vadd.f32 -14.285714, %v909_v15  ;;  %v1870_v62 = vadd.f32 -14.285714, %v2792_v36 }
 0x19a   : > { %v2050_v43 = vpop.eup %2049  ;;  %v1122_v23 = vmul.f32 1.442695, %v1872_v41  ;;  %v1114_v26 = vmul.f32 1.442695, %v1868_v30  ;;  %v964_v30 = vadd.s32 24, %v2767_v47 }
 0x19b   : > { %v1108_v49 = vmul.f32 1.442695, %v1865_v9  ;;  %v2843_v51 = vmul.f32 %v2050_v43, %v2802_v4  ;;  %v2052_v54 = vpop.eup %2051  ;;  %v1100_v21 = vmul.f32 1.442695, %v1861_v32  ;;  %v1871_v9 = vadd.f32 -14.285714, %v2816_v10 }
 0x19c   : > { %2055 = vpow2.f32 %v1122_v23  ;;  %v2054_v59 = vpop.eup %2053  ;;  %v1134_v34 = vmul.f32 %v2052_v54, %v2802_v4  ;;  %v1118_v43 = vmul.f32 1.442695, %v1870_v62  ;;  %v1013_v23 = vpop.permute.xlu2 %1012  ;;  %vm1049_vm13 = vcmp.ne.s32.totalorder %v964_v30, %v2769_v8 }
 0x19d   : > { %v1251_v37 = vsel %vm2838_vm9, %v2843_v51, 0.0  ;;  %2057 = vpow2.f32 %v1108_v49  ;;  %v1135_v52 = vmul.f32 %v2054_v59, %v2802_v4  ;;  %vm1045_vm9 = vcmp.eq.s32.totalorder %v1028_v24, %v2790_v57 }
 0x19e   : > { %1260 = vadd.xlane.f32.xlu1 %v1243_v58  ;;  %1276 = vadd.xlane.f32.xlu0 %v1251_v37  ;;  %2059 = vpow2.f32 %v1114_v26  ;;  %v1247_v38 = vsel %vm1067_vm4, %v1134_v34, 0.0  ;;  %vm2916_vm11 = vmand %vm1045_vm9, %vm1061_vm0  ;;  %v1120_v46 = vmul.f32 1.442695, %v1871_v9  ;;  %vm1048_vm0 = vcmp.ne.s32.totalorder %v963_v1, %v2769_v8 }
 0x19f   : > { %v929_v63 = vpop.f32.mrf.mxu2  ;;  %v939_v42 = vpop.f32.mrf.mxu3  ;;  %1177 = vadd.xlane.f32.xlu2 %v1137_v31  ;;  %v1248_v17 = vsel %vm1068_vm3, %v1135_v52, 0.0  ;;  %v1098_v31 = vmul.f32 1.442695, %v1860_v14  ;;  %vm1040_vm14 = vcmp.eq.s32.totalorder %v1013_v23, %v2790_v57  ;;  %vm1064_vm15 = vmand %vm1032_vm1, %vm1048_vm0  ;;  %v973_v10 = vadd.s32 96, %v2767_v47 }
 0x1a0   : > { %v1869_v7 = vadd.f32 -14.285714, %v929_v63  ;;  %v1873_v20 = vadd.f32 -14.285714, %v939_v42  ;;  %vm1065_vm3 = vmand %vm1033_vm12, %vm1049_vm13  ;;  %v974_v58 = vadd.s32 104, %v2767_v47  ;;  %vm690_vm13 = vcmask 7168  }
 0x1a1   : > { %vm1058_vm8 = vcmp.ne.s32.totalorder %v973_v10, %v2769_v8  ;;  %691 = vst.msk [vmem:[#allocation4] sm:$0xff] %vm690_vm13, %v2250_v5 }
 0x1a2   : > { %v1116_v3 = vmul.f32 1.442695, %v1869_v7  ;;  %v1124_v13 = vmul.f32 1.442695, %v1873_v20  ;;  %v2056_v27 = vpop.eup %2055  ;;  %vm1074_vm1 = vmand %vm1042_vm5, %vm1058_vm8  ;;  %vm1059_vm0 = vcmp.ne.s32.totalorder %v974_v58, %v2769_v8  ;;  %692 = vst.msk [vmem:[#allocation4 + $0x8] sm:$0xff] %vm690_vm13, %v2250_v5 }
 0x1a3   : > { %v2867_v44 = vmul.f32 %v2056_v27, %v2802_v4  ;;  %v2058_v56 = vpop.eup %2057  ;;  %693 = vst.msk [vmem:[#allocation4 + $0x10] sm:$0xff] %vm690_vm13, %v2250_v5 }
 0x1a4   : > { %2061 = vpow2.f32 %v1116_v3  ;;  %v2879_v16 = vmul.f32 %v2058_v56, %v2802_v4  ;;  %v2060_v33 = vpop.eup %2059  ;;  %v1022_v45 = vpop.permute.xlu2 %1021  ;;  %694 = vst.msk [vmem:[#allocation4 + $0x18] sm:$0xff] %vm690_vm13, %v2250_v5 }
 0x1a5   : > { %2063 = vpow2.f32 %v1124_v13  ;;  %v1256_v25 = vsel %vm2874_vm6, %v2867_v44, 0.0  ;;  %v1139_v29 = vmul.f32 %v2060_v33, %v2802_v4  ;;  %vm1043_vm9 = vcmp.eq.s32.totalorder %v1022_v45, %v2790_v57  ;;  %695 = vst.msk [vmem:[#allocation4 + $0x20] sm:$0xff] %vm690_vm13, %v2250_v5 }
 0x1a6   : > { %1268 = vadd.xlane.f32.xlu1 %v1247_v38  ;;  %1270 = vadd.xlane.f32.xlu0 %v1248_v17  ;;  %v1249_v61 = vsel %vm2886_vm7, %v2879_v16, 0.0  ;;  %2065 = vpow2.f32 %v1098_v31  ;;  %vm1075_vm12 = vmand %vm1043_vm9, %vm1059_vm0  ;;  %696 = vst.msk [vmem:[#allocation4 + $0x28] sm:$0xff] %vm690_vm13, %v2250_v5 }
 0x1a7   : > { %1163 = vadd.xlane.f32.xlu2 %v1130_v19  ;;  %2067 = vpow2.f32 %v1100_v21  ;;  %697 = vst.msk [vmem:[#allocation4 + $0x30] sm:$0xff] %vm690_vm13, %v2250_v5 }
 0x1a8   : > { %2069 = vpow2.f32 %v1118_v43  ;;  %698 = vst.msk [vmem:[#allocation4 + $0x38] sm:$0xff] %vm690_vm13, %v2250_v5 }
 0x1a9   : > { %2071 = vpow2.f32 %v1120_v46  ;;  %699 = vst.msk [vmem:[#allocation4 + $0x40] sm:$0xff] %vm690_vm13, %v2250_v5  ;;  %v1146_v32 = vld [vmem:[#allocation4 + $0x8] sm:$0xff] }
 0x1aa   : > { %v2062_v22 = vpop.eup %2061  ;;  %700 = vst.msk [vmem:[#allocation4 + $0x48] sm:$0xff] %vm690_vm13, %v2250_v5 }
 0x1ab   : > { %v2064_v35 = vpop.eup %2063  ;;  %v2897_v39 = vmul.f32 %v2062_v22, %v2802_v4  ;;  %701 = vst.msk [vmem:[#allocation4 + $0x50] sm:$0xff] %vm690_vm13, %v2250_v5 }
 0x1ac   : > { %v2908_v28 = vmul.f32 %v2064_v35, %v2802_v4  ;;  %v2066_v19 = vpop.eup %2065  ;;  %702 = vst.msk [vmem:[#allocation4 + $0x58] sm:$0xff] %vm690_vm13, %v2250_v5  ;;  %v1149_v11 = vld [vmem:[#allocation4 + $0x20] sm:$0xff] }
 0x1ad   : > { %v1253_v6 = vsel %vm2903_vm10, %v2897_v39, 0.0  ;;  %v1131_v40 = vmul.f32 %v2066_v19, %v2802_v4  ;;  %v2068_v49 = vpop.eup %2067  ;;  %703 = vst.msk [vmem:[#allocation4 + $0x60] sm:$0xff] %vm690_vm13, %v2250_v5 }
 0x1ae   : > { %1179 = vadd.xlane.f32.xlu1 %v2843_v51  ;;  %1181 = vadd.xlane.f32.xlu0 %v1139_v29  ;;  %v1257_v18 = vsel %vm2916_vm11, %v2908_v28, 0.0  ;;  %v971_v51 = vadd.s32 80, %v2767_v47  ;;  %v1132_v36 = vmul.f32 %v2068_v49, %v2802_v4  ;;  %v2070_v54 = vpop.eup %2069  ;;  %704 = vst.msk [vmem:[#allocation4 + $0x68] sm:$0xff] %vm690_vm13, %v2250_v5  ;;  %v1151_v43 = vld [vmem:[#allocation4 + $0x30] sm:$0xff] }
 0x1af   : > { %1171 = vadd.xlane.f32.xlu2 %v1134_v34  ;;  %v1244_v0 = vsel %vm1064_vm15, %v1131_v40, 0.0  ;;  %v2072_v37 = vpop.eup %2071  ;;  %v1141_v59 = vmul.f32 %v2070_v54, %v2802_v4  ;;  %705 = vst.msk [vmem:[#allocation4 + $0x70] sm:$0xff] %vm690_vm13, %v2250_v5  ;;  %v1152_v23 = vld [vmem:[#allocation4 + $0x38] sm:$0xff] }
 0x1b0   : > { %vm1056_vm2 = vcmp.ne.s32.totalorder %v971_v51, %v2769_v8  ;;  %v1245_v53 = vsel %vm1065_vm3, %v1132_v36, 0.0  ;;  %v1142_v60 = vmul.f32 %v2072_v37, %v2802_v4  ;;  %706 = vst.msk [vmem:[#allocation4 + $0x78] sm:$0xff] %vm690_vm13, %v2250_v5  ;;  %v1145_v8 = vld [vmem:[#allocation4] sm:$0xff] }
 0x1b1   : > { %vm1072_vm4 = vmand %vm1040_vm14, %vm1056_vm2  ;;  %v1254_v26 = vsel %vm1074_vm1, %v1141_v59, 0.0  ;;  %707 = vst.msk [vmem:[#allocation5] sm:$0xff] %vm690_vm13, %v2250_v5  ;;  %v1153_v15 = vld [vmem:[#allocation4 + $0x40] sm:$0xff] }
 0x1b2   : > { %v1252_v12 = vsel %vm1072_vm4, %v1139_v29, 0.0  ;;  %v1255_v47 = vsel %vm1075_vm12, %v1142_v60, 0.0  ;;  %708 = vst.msk [vmem:[#allocation5 + $0x8] sm:$0xff] %vm690_vm13, %v2250_v5  ;;  %v1154_v29 = vld [vmem:[#allocation4 + $0x48] sm:$0xff]  ;;  %v1155_v55 = vld [vmem:[#allocation4 + $0x50] sm:$0xff] }
 0x1b3   : > { %709 = vst.msk [vmem:[#allocation5 + $0x10] sm:$0xff] %vm690_vm13, %v2250_v5 }
 0x1b4   : > { %710 = vst.msk [vmem:[#allocation5 + $0x18] sm:$0xff] %vm690_vm13, %v2250_v5 }
 0x1b5   : > { %711 = vst.msk [vmem:[#allocation5 + $0x20] sm:$0xff] %vm690_vm13, %v2250_v5 }
 0x1b6   : > { %1173 = vadd.xlane.f32.xlu1 %v1135_v52  ;;  %1175 = vadd.xlane.f32.xlu0 %v2879_v16  ;;  %712 = vst.msk [vmem:[#allocation5 + $0x28] sm:$0xff] %vm690_vm13, %v2250_v5 }
 0x1b7   : > { %1165 = vadd.xlane.f32.xlu2 %v1131_v40  ;;  %713 = vst.msk [vmem:[#allocation5 + $0x30] sm:$0xff] %vm690_vm13, %v2250_v5  ;;  %v1147_v40 = vld [vmem:[#allocation4 + $0x10] sm:$0xff] }
 0x1b8   : > { %714 = vst.msk [vmem:[#allocation5 + $0x38] sm:$0xff] %vm690_vm13, %v2250_v5  ;;  %v1226_v57 = vld [vmem:[#allocation5] sm:$0xff] }
 0x1b9   : > { %715 = vst.msk [vmem:[#allocation5 + $0x40] sm:$0xff] %vm690_vm13, %v2250_v5 }
 0x1ba   : > { %716 = vst.msk [vmem:[#allocation5 + $0x48] sm:$0xff] %vm690_vm13, %v2250_v5 }
 0x1bb   : > { %717 = vst.msk [vmem:[#allocation5 + $0x50] sm:$0xff] %vm690_vm13, %v2250_v5 }
 0x1bc   : > { %718 = vst.msk [vmem:[#allocation5 + $0x58] sm:$0xff] %vm690_vm13, %v2250_v5  ;;  %v1230_v34 = vld [vmem:[#allocation5 + $0x20] sm:$0xff] }
 0x1bd   : > { %719 = vst.msk [vmem:[#allocation5 + $0x60] sm:$0xff] %vm690_vm13, %v2250_v5  ;;  %v1231_v48 = vld [vmem:[#allocation5 + $0x28] sm:$0xff] }
 0x1be   : > { %1262 = vadd.xlane.f32.xlu1 %v1244_v0  ;;  %1264 = vadd.xlane.f32.xlu0 %v1245_v53  ;;  %720 = vst.msk [vmem:[#allocation5 + $0x68] sm:$0xff] %vm690_vm13, %v2250_v5  ;;  %v1232_v31 = vld [vmem:[#allocation5 + $0x30] sm:$0xff] }
 0x1bf   : > { %1278 = vadd.xlane.f32.xlu2 %v1252_v12  ;;  %721 = vst.msk [vmem:[#allocation5 + $0x70] sm:$0xff] %vm690_vm13, %v2250_v5 }
 0x1c0   : > { %722 = vst.msk [vmem:[#allocation5 + $0x78] sm:$0xff] %vm690_vm13, %v2250_v5  ;;  %v1234_v20 = vld [vmem:[#allocation5 + $0x40] sm:$0xff] }
 0x1c1   : > { %v1235_v56 = vld [vmem:[#allocation5 + $0x48] sm:$0xff] }
 0x1c6   : > { %1167 = vadd.xlane.f32.xlu1 %v1132_v36  ;;  %1282 = vadd.xlane.f32.xlu0 %v1254_v26  ;;  %v1229_v26 = vld [vmem:[#allocation5 + $0x18] sm:$0xff] }
 0x1c7   : > { %1284 = vadd.xlane.f32.xlu2 %v1255_v47 }
 0x1ce   : > { %1185 = vadd.xlane.f32.xlu1 %v1141_v59  ;;  %1187 = vadd.xlane.f32.xlu0 %v1142_v60  ;;  %v1228_v60 = vld [vmem:[#allocation5 + $0x10] sm:$0xff] }
 0x1cf   : > { %1272 = vadd.xlane.f32.xlu2 %v1249_v61 }
 0x1d6   : > { %1280 = vadd.xlane.f32.xlu1 %v1253_v6  ;;  %1288 = vadd.xlane.f32.xlu0 %v1257_v18 }
 0x1d7   : > { %1183 = vadd.xlane.f32.xlu2 %v2897_v39 }
 0x1de   : > { %1286 = vadd.xlane.f32.xlu1 %v1256_v25 }
 0x1df   : > { %1189 = vadd.xlane.f32.xlu2 %v2867_v44  ;;  %v1227_v44 = vld [vmem:[#allocation5 + $0x8] sm:$0xff] }
 0x1e6   : > { %1191 = vadd.xlane.f32.xlu1 %v2908_v28  ;;  %v1150_v28 = vld [vmem:[#allocation4 + $0x28] sm:$0xff] }
 0x201   : > { %v1162_v4 = vpop.xlane.xlu0 %1161 }
 0x202   : > { %v1193_v63 = vadd.f32 %v1162_v4, %v1145_v8  ;;  %v1259_v42 = vpop.xlane.xlu2 %1258  ;;  %v1236_v8 = vld [vmem:[#allocation5 + $0x50] sm:$0xff] }
 0x203   : > { %v1290_v7 = vadd.f32 %v1259_v42, %v1226_v57 }
 0x204   : > { %1210 = vst.msk [vmem:[#allocation4] sm:$0xff] %vm690_vm13, %v1193_v63 }
 0x205   : > { %1306 = vst.msk [vmem:[#allocation5] sm:$0xff] %vm690_vm13, %v1290_v7 }
 0x209   : > { %v1275_v52 = vpop.xlane.xlu1 %1274  ;;  %v1170_v2 = vpop.xlane.xlu0 %1169 }
 0x20a   : > { %v1298_v3 = vadd.f32 %v1275_v52, %v1234_v20  ;;  %v1197_v13 = vadd.f32 %v1170_v2, %v1149_v11  ;;  %v1267_v27 = vpop.xlane.xlu2 %1266 }
 0x20b   : > { %v1294_v14 = vadd.f32 %v1267_v27, %v1230_v34  ;;  %v1325_v54 = vld [vmem:[#allocation4] sm:$0xff] }
 0x20c   : > { %1314 = vst.msk [vmem:[#allocation5 + $0x40] sm:$0xff] %vm690_vm13, %v1298_v3  ;;  %v3044_v1 = vld [vmem:[#allocation5] sm:$0xff] }
 0x20d   : > { %1214 = vst.msk [vmem:[#allocation4 + $0x20] sm:$0xff] %vm690_vm13, %v1197_v13  ;;  %v1405_v46 = vmax.f32 %v3044_v1, 1e-37  ;;  %vm1357_vm6 = vcmp.gt.f32.partialorder %v3044_v1, 0.0 }
 0x20e   : > { %1310 = vst.msk [vmem:[#allocation5 + $0x20] sm:$0xff] %vm690_vm13, %v1294_v14  ;;  %v1874_v14 = vsel %vm1357_vm6, 1.0, %v2250_v5 }
 0x20f   : > { %2073 = vlog2.f32 %v1405_v46 }
 0x210   : > { %2075 = vlog2.f32 %v1325_v54 }
 0x211   : > { %v1261_v38 = vpop.xlane.xlu1 %1260  ;;  %v1277_v17 = vpop.xlane.xlu0 %1276 }
 0x212   : > { %v1291_v50 = vadd.f32 %v1261_v38, %v1227_v44  ;;  %v1299_v16 = vadd.f32 %v1277_v17, %v1235_v56  ;;  %v1178_v25 = vpop.xlane.xlu2 %1177 }
 0x213   : > { %v1201_v24 = vadd.f32 %v1178_v25, %v1153_v15  ;;  %v3051_v53 = vld [vmem:[#allocation5 + $0x40] sm:$0xff] }
 0x214   : > { %1307 = vst.msk [vmem:[#allocation5 + $0x8] sm:$0xff] %vm690_vm13, %v1291_v50  ;;  %v1413_v45 = vmax.f32 %v3051_v53, 1e-37  ;;  %v1329_v59 = vld [vmem:[#allocation4 + $0x20] sm:$0xff]  ;;  %vm1365_vm10 = vcmp.gt.f32.partialorder %v3051_v53, 0.0 }
 0x215   : > { %1315 = vst.msk [vmem:[#allocation5 + $0x48] sm:$0xff] %vm690_vm13, %v1299_v16  ;;  %v3049_v30 = vld [vmem:[#allocation5 + $0x20] sm:$0xff]  ;;  %v2074_v57 = vpop.eup %2073  ;;  %v1882_v15 = vsel %vm1365_vm10, 1.0, %v2250_v5 }
 0x216   : > { %1218 = vst.msk [vmem:[#allocation4 + $0x40] sm:$0xff] %vm690_vm13, %v1201_v24  ;;  %v1409_v58 = vmax.f32 %v3049_v30, 1e-37  ;;  %v2076_v3 = vpop.eup %2075  ;;  %v3081_v38 = vmul.f32 0.6931472, %v2074_v57  ;;  %vm1361_vm11 = vcmp.gt.f32.partialorder %v3049_v30, 0.0 }
 0x218   : > { %2077 = vlog2.f32 %v1409_v58 }
 0x219   : > { %v1269_v61 = vpop.xlane.xlu1 %1268  ;;  %v1271_v33 = vpop.xlane.xlu0 %1270  ;;  %2079 = vlog2.f32 %v1329_v59 }
 0x21a   : > { %v1295_v22 = vadd.f32 %v1269_v61, %v1231_v48  ;;  %v1296_v35 = vadd.f32 %v1271_v33, %v1232_v31  ;;  %v1164_v39 = vpop.xlane.xlu2 %1163  ;;  %2081 = vlog2.f32 %v1413_v45  ;;  %v3089_v48 = vmul.f32 0.6931472, %v2076_v3  ;;  %v1238_v61 = vld [vmem:[#allocation5 + $0x60] sm:$0xff] }
 0x21b   : > { %v1194_v21 = vadd.f32 %v1164_v39, %v1146_v32  ;;  %v3056_v37 = vld [vmem:[#allocation5 + $0x8] sm:$0xff]  ;;  %v1148_v32 = vld [vmem:[#allocation4 + $0x18] sm:$0xff]  ;;  %v1558_v33 = vsel %vm690_vm13, %v1874_v14, 0.0 }
 0x21c   : > { %1311 = vst.msk [vmem:[#allocation5 + $0x28] sm:$0xff] %vm690_vm13, %v1295_v22  ;;  %vm1358_vm7 = vcmp.gt.f32.partialorder %v3056_v37, 0.0  ;;  %v3062_v42 = vld [vmem:[#allocation5 + $0x48] sm:$0xff]  ;;  %v1406_v2 = vmax.f32 %v3056_v37, 1e-37  ;;  %v3093_v22 = vsel %vm690_vm13, %v1882_v15, 0.0 }
 0x21d   : > { %1312 = vst.msk [vmem:[#allocation5 + $0x30] sm:$0xff] %vm690_vm13, %v1296_v35  ;;  %v1333_v47 = vld [vmem:[#allocation4 + $0x40] sm:$0xff]  ;;  %v1875_v44 = vsel %vm1358_vm7, 1.0, %v2250_v5  ;;  %v1414_v56 = vmax.f32 %v3062_v42, 1e-37  ;;  %v1239_v39 = vld [vmem:[#allocation5 + $0x68] sm:$0xff] }
 0x21e   : > { %1211 = vst.msk [vmem:[#allocation4 + $0x8] sm:$0xff] %vm690_vm13, %v1194_v21  ;;  %2083 = vlog2.f32 %v1333_v47  ;;  %v2078_v17 = vpop.eup %2077  ;;  %v1559_v24 = vsel %vm690_vm13, %v1875_v44, 0.0  ;;  %v3098_v21 = vsel %vm1361_vm11, 1.0, %v2250_v5  ;;  %vm1366_vm14 = vcmp.gt.f32.partialorder %v3062_v42, 0.0 }
 0x21f   : > { %v2080_v16 = vpop.eup %2079 }
 0x220   : > { %v2082_v31 = vpop.eup %2081 }
 0x221   : > { %v1180_v6 = vpop.xlane.xlu1 %1179  ;;  %v1182_v41 = vpop.xlane.xlu0 %1181 }
 0x222   : > { %v1202_v18 = vadd.f32 %v1180_v6, %v1154_v29  ;;  %v1203_v62 = vadd.f32 %v1182_v41, %v1155_v55  ;;  %v1172_v9 = vpop.xlane.xlu2 %1171  ;;  %v1430_v55 = vmul.f32 0.6931472, %v2078_v17 }
 0x223   : > { %v1198_v19 = vadd.f32 %v1172_v9, %v1150_v28  ;;  %v3065_v52 = vld [vmem:[#allocation5 + $0x28] sm:$0xff]  ;;  %v1453_v28 = vsub.f32 %v3089_v48, %v3081_v38  ;;  %v1382_v9 = vmul.f32 0.6931472, %v2080_v16 }
 0x224   : > { %1219 = vst.msk [vmem:[#allocation4 + $0x48] sm:$0xff] %vm690_vm13, %v1202_v18  ;;  %v3068_v27 = vld [vmem:[#allocation5 + $0x30] sm:$0xff]  ;;  %v1410_v50 = vmax.f32 %v3065_v52, 1e-37  ;;  %v2084_v35 = vpop.eup %2083  ;;  %v1560_v18 = vadd.f32 %v1559_v24, %v1558_v33  ;;  %vm1362_vm15 = vcmp.gt.f32.partialorder %v3065_v52, 0.0 }
 0x225   : > { %1220 = vst.msk [vmem:[#allocation4 + $0x50] sm:$0xff] %vm690_vm13, %v1203_v62  ;;  %v1326_v7 = vld [vmem:[#allocation4 + $0x8] sm:$0xff]  ;;  %v1411_v25 = vmax.f32 %v3068_v27, 1e-37  ;;  %v1457_v45 = vsub.f32 %v1382_v9, %v1430_v55  ;;  %vm1363_vm4 = vcmp.gt.f32.partialorder %v3068_v27, 0.0  ;;  %v1879_v3 = vsel %vm1362_vm15, 1.0, %v2250_v5 }
 0x226   : > { %1215 = vst.msk [vmem:[#allocation4 + $0x28] sm:$0xff] %vm690_vm13, %v1198_v19  ;;  %2085 = vlog2.f32 %v1326_v7  ;;  %v1567_v30 = vsel %vm690_vm13, %v1879_v3, 0.0 }
 0x227   : > { %2087 = vlog2.f32 %v1406_v2  ;;  %v1233_v2 = vld [vmem:[#allocation5 + $0x38] sm:$0xff]  ;;  %v1473_v24 = vsel %vm1361_vm11, %v1457_v45, 0.0 }
 0x228   : > { %2089 = vlog2.f32 %v1414_v56  ;;  %v1469_v56 = vsel %vm1357_vm6, %v1453_v28, 0.0 }
 0x229   : > { %v1174_v49 = vpop.xlane.xlu1 %1173  ;;  %v1176_v51 = vpop.xlane.xlu0 %1175  ;;  %2091 = vlog2.f32 %v1410_v50  ;;  %v1880_v50 = vsel %vm1363_vm4, 1.0, %v2250_v5  ;;  %v1486_v55 = vsel %vm690_vm13, %v1469_v56, 0.0 }
 0x22a   : > { %v1199_v36 = vadd.f32 %v1174_v49, %v1151_v43  ;;  %v1200_v10 = vadd.f32 %v1176_v51, %v1152_v23  ;;  %v1166_v0 = vpop.xlane.xlu2 %1165  ;;  %2093 = vlog2.f32 %v1411_v25  ;;  %v3103_v49 = vmul.f32 0.6931472, %v2082_v31 }
 0x22b   : > { %v1195_v12 = vadd.f32 %v1166_v0, %v1147_v40  ;;  %v1334_v29 = vld [vmem:[#allocation4 + $0x48] sm:$0xff] }
 0x22c   : > { %1216 = vst.msk [vmem:[#allocation4 + $0x30] sm:$0xff] %vm690_vm13, %v1199_v36  ;;  %v2086_v19 = vpop.eup %2085  ;;  %2095 = vlog2.f32 %v1334_v29  ;;  %v1335_v58 = vld [vmem:[#allocation4 + $0x50] sm:$0xff] }
 0x22d   : > { %1217 = vst.msk [vmem:[#allocation4 + $0x38] sm:$0xff] %vm690_vm13, %v1200_v10  ;;  %v1330_v62 = vld [vmem:[#allocation4 + $0x28] sm:$0xff]  ;;  %v3108_v10 = vmul.f32 0.6931472, %v2084_v35  ;;  %v2088_v0 = vpop.eup %2087 }
 0x22e   : > { %1212 = vst.msk [vmem:[#allocation4 + $0x10] sm:$0xff] %vm690_vm13, %v1195_v12  ;;  %2097 = vlog2.f32 %v1330_v62  ;;  %v1237_v62 = vld [vmem:[#allocation5 + $0x58] sm:$0xff] }
 0x22f   : > { %v1461_v25 = vsub.f32 %v3108_v10, %v3103_v49 }
 0x231   : > { %v1263_v4 = vpop.xlane.xlu1 %1262  ;;  %v1265_v63 = vpop.xlane.xlu0 %1264 }
 0x232   : > { %v1292_v20 = vadd.f32 %v1263_v4, %v1228_v60  ;;  %v1293_v11 = vadd.f32 %v1265_v63, %v1229_v26  ;;  %v1279_v34 = vpop.xlane.xlu2 %1278  ;;  %v1376_v60 = vmul.f32 0.6931472, %v2086_v19  ;;  %v2090_v26 = vpop.eup %2089  ;;  %v1157_v4 = vld [vmem:[#allocation4 + $0x60] sm:$0xff]  ;;  %v1158_v63 = vld [vmem:[#allocation4 + $0x68] sm:$0xff]  ;;  %v3154_v19 = vsel %vm690_vm13, %v1473_v24, 0.0 }
 0x233   : > { %v1300_v13 = vadd.f32 %v1279_v34, %v1236_v8  ;;  %v2092_v57 = vpop.eup %2091  ;;  %v1331_v44 = vld [vmem:[#allocation4 + $0x30] sm:$0xff]  ;;  %v1440_v9 = vmul.f32 0.6931472, %v2090_v26 }
 0x234   : > { %1308 = vst.msk [vmem:[#allocation5 + $0x10] sm:$0xff] %vm690_vm13, %v1292_v20  ;;  %v2094_v34 = vpop.eup %2093  ;;  %v1332_v37 = vld [vmem:[#allocation4 + $0x38] sm:$0xff] }
 0x235   : > { %1309 = vst.msk [vmem:[#allocation5 + $0x18] sm:$0xff] %vm690_vm13, %v1293_v11  ;;  %v1327_v40 = vld [vmem:[#allocation4 + $0x10] sm:$0xff]  ;;  %v1424_v11 = vmul.f32 0.6931472, %v2088_v0  ;;  %v2096_v15 = vpop.eup %2095 }
 0x236   : > { %1316 = vst.msk [vmem:[#allocation5 + $0x50] sm:$0xff] %vm690_vm13, %v1300_v13  ;;  %2099 = vlog2.f32 %v1327_v40  ;;  %v1883_v13 = vsel %vm1366_vm14, 1.0, %v2250_v5  ;;  %v2098_v48 = vpop.eup %2097  ;;  %v1392_v45 = vmul.f32 0.6931472, %v2096_v15 }
 0x237   : > { %v1454_v16 = vsub.f32 %v1376_v60, %v1424_v11  ;;  %v3167_v60 = vmul.f32 0.6931472, %v2094_v34 }
 0x238   : > { %v1462_v15 = vsub.f32 %v1392_v45, %v1440_v9 }
 0x239   : > { %v1168_v6 = vpop.xlane.xlu1 %1167  ;;  %v1283_v41 = vpop.xlane.xlu0 %1282  ;;  %v1470_v49 = vsel %vm1358_vm7, %v1454_v16, 0.0 }
 0x23a   : > { %v1196_v43 = vadd.f32 %v1168_v6, %v1148_v32  ;;  %v1302_v23 = vadd.f32 %v1283_v41, %v1238_v61  ;;  %v1285_v46 = vpop.xlane.xlu2 %1284  ;;  %v1569_v6 = vsel %vm690_vm13, %v1880_v50, 0.0  ;;  %v3150_v41 = vsel %vm690_vm13, %v1883_v13, 0.0 }
 0x23b   : > { %v1303_v51 = vadd.f32 %v1285_v46, %v1239_v39  ;;  %v3105_v36 = vld [vmem:[#allocation5 + $0x10] sm:$0xff]  ;;  %v1565_v39 = vsel %vm690_vm13, %v3098_v21, 0.0  ;;  %v1384_v21 = vmul.f32 0.6931472, %v2098_v48  ;;  %v1487_v53 = vsel %vm690_vm13, %v1470_v49, 0.0 }
 0x23c   : > { %1213 = vst.msk [vmem:[#allocation4 + $0x18] sm:$0xff] %vm690_vm13, %v1196_v43  ;;  %v3111_v54 = vld [vmem:[#allocation5 + $0x18] sm:$0xff]  ;;  %vm1359_vm2 = vcmp.gt.f32.partialorder %v3105_v36, 0.0  ;;  %v1407_v12 = vmax.f32 %v3105_v36, 1e-37  ;;  %v2100_v33 = vpop.eup %2099  ;;  %v3200_v52 = vsel %vm1366_vm14, %v1462_v15, 0.0 }
 0x23d   : > { %1318 = vst.msk [vmem:[#allocation5 + $0x60] sm:$0xff] %vm690_vm13, %v1302_v23  ;;  %vm1360_vm3 = vcmp.gt.f32.partialorder %v3111_v54, 0.0  ;;  %v1876_v59 = vsel %vm1359_vm2, 1.0, %v2250_v5  ;;  %v1408_v47 = vmax.f32 %v3111_v54, 1e-37  ;;  %v1241_v43 = vld [vmem:[#allocation5 + $0x78] sm:$0xff] }
 0x23e   : > { %1319 = vst.msk [vmem:[#allocation5 + $0x68] sm:$0xff] %vm690_vm13, %v1303_v51  ;;  %2101 = vlog2.f32 %v1407_v12  ;;  %v1877_v8 = vsel %vm1360_vm3, 1.0, %v2250_v5  ;;  %v1561_v7 = vsel %vm690_vm13, %v1876_v59, 0.0  ;;  %v1156_v23 = vld [vmem:[#allocation4 + $0x58] sm:$0xff]  ;;  %v3157_v46 = vld [vmem:[#allocation5 + $0x50] sm:$0xff]  ;;  %v3163_v51 = vsel %vm1365_vm10, %v1461_v25, 0.0 }
 0x23f   : > { %v1563_v20 = vsel %vm690_vm13, %v1877_v8, 0.0  ;;  %2103 = vlog2.f32 %v1335_v58  ;;  %v1562_v14 = vadd.f32 %v1561_v7, %v1560_v18  ;;  %v1378_v10 = vmul.f32 0.6931472, %v2100_v33 }
 0x240   : > { %2105 = vlog2.f32 %v1408_v47  ;;  %v1432_v12 = vmul.f32 0.6931472, %v2092_v57  ;;  %vm1367_vm5 = vcmp.gt.f32.partialorder %v3157_v46, 0.0 }
 0x241   : > { %v1186_v38 = vpop.xlane.xlu1 %1185  ;;  %v1188_v17 = vpop.xlane.xlu0 %1187  ;;  %v1564_v1 = vadd.f32 %v1563_v20, %v1562_v14  ;;  %2107 = vlog2.f32 %v1331_v44  ;;  %v1884_v48 = vsel %vm1367_vm5, 1.0, %v2250_v5 }
 0x242   : > { %v1205_v31 = vadd.f32 %v1186_v38, %v1157_v4  ;;  %v1206_v32 = vadd.f32 %v1188_v17, %v1158_v63  ;;  %v1273_v61 = vpop.xlane.xlu2 %1272  ;;  %v1415_v4 = vmax.f32 %v3157_v46, 1e-37  ;;  %v1458_v7 = vsub.f32 %v1384_v21, %v1432_v12 }
 0x243   : > { %v1297_v35 = vadd.f32 %v1273_v61, %v1233_v2  ;;  %v1328_v29 = vld [vmem:[#allocation4 + $0x18] sm:$0xff]  ;;  %v1566_v40 = vadd.f32 %v1565_v39, %v1564_v1  ;;  %v1488_v38 = vadd.f32 %v1487_v53, %v1486_v55 }
 0x244   : > { %v2102_v28 = vpop.eup %2101  ;;  %1222 = vst.msk [vmem:[#allocation4 + $0x60] sm:$0xff] %vm690_vm13, %v1205_v31  ;;  %2109 = vlog2.f32 %v1328_v29  ;;  %v3171_v3 = vld [vmem:[#allocation5 + $0x60] sm:$0xff]  ;;  %v1474_v31 = vsel %vm1362_vm15, %v1458_v7, 0.0  ;;  %v1159_v29 = vld [vmem:[#allocation4 + $0x70] sm:$0xff] }
 0x245   : > { %v2104_v18 = vpop.eup %2103  ;;  %1223 = vst.msk [vmem:[#allocation4 + $0x68] sm:$0xff] %vm690_vm13, %v1206_v32  ;;  %v1426_v0 = vmul.f32 0.6931472, %v2102_v28  ;;  %v1568_v34 = vadd.f32 %v1567_v30, %v1566_v40  ;;  %2111 = vlog2.f32 %v1332_v37  ;;  %v1417_v16 = vmax.f32 %v3171_v3, 1e-37  ;;  %v1240_v32 = vld [vmem:[#allocation5 + $0x70] sm:$0xff] }
 0x246   : > { %1313 = vst.msk [vmem:[#allocation5 + $0x38] sm:$0xff] %vm690_vm13, %v1297_v35  ;;  %v2106_v58 = vpop.eup %2105  ;;  %v3165_v59 = vmul.f32 0.6931472, %v2104_v18  ;;  %2113 = vlog2.f32 %v1415_v4  ;;  %v3195_v55 = vld [vmem:[#allocation5 + $0x68] sm:$0xff]  ;;  %v1495_v54 = vsel %vm690_vm13, %v1474_v31, 0.0  ;;  %vm1369_vm9 = vcmp.gt.f32.partialorder %v3171_v3, 0.0 }
 0x247   : > { %v2108_v26 = vpop.eup %2107  ;;  %v1455_v63 = vsub.f32 %v1378_v10, %v1426_v0  ;;  %v1428_v44 = vmul.f32 0.6931472, %v2106_v58  ;;  %v1570_v1 = vadd.f32 %v1569_v6, %v1568_v34  ;;  %v1418_v12 = vmax.f32 %v3195_v55, 1e-37 }
 0x248   : > { %v1386_v25 = vmul.f32 0.6931472, %v2108_v26  ;;  %vm1370_vm0 = vcmp.gt.f32.partialorder %v3195_v55, 0.0 }
 0x249   : > { %v1281_v47 = vpop.xlane.xlu1 %1280  ;;  %v1289_v8 = vpop.xlane.xlu0 %1288  ;;  %v1471_v56 = vsel %vm1359_vm2, %v1455_v63, 0.0  ;;  %v1886_v63 = vsel %vm1369_vm9, 1.0, %v2250_v5 }
 0x24a   : > { %v2110_v20 = vpop.eup %2109  ;;  %v1301_v11 = vadd.f32 %v1281_v47, %v1237_v62  ;;  %v1305_v2 = vadd.f32 %v1289_v8, %v1241_v43  ;;  %v1184_v57 = vpop.xlane.xlu2 %1183  ;;  %v1489_v17 = vsel %vm690_vm13, %v1471_v56, 0.0  ;;  %v1459_v49 = vsub.f32 %v1386_v25, %v3167_v60 }
 0x24b   : > { %v1204_v13 = vadd.f32 %v1184_v57, %v1156_v23  ;;  %v1380_v14 = vmul.f32 0.6931472, %v2110_v20  ;;  %v1337_v33 = vld [vmem:[#allocation4 + $0x60] sm:$0xff]  ;;  %v1490_v39 = vadd.f32 %v1489_v17, %v1488_v38  ;;  %v2112_v21 = vpop.eup %2111  ;;  %v1577_v23 = vsel %vm690_vm13, %v1884_v48, 0.0  ;;  %v1160_v20 = vld [vmem:[#allocation4 + $0x78] sm:$0xff] }
 0x24c   : > { %1317 = vst.msk [vmem:[#allocation5 + $0x58] sm:$0xff] %vm690_vm13, %v1301_v11  ;;  %v1338_v40 = vld [vmem:[#allocation4 + $0x68] sm:$0xff]  ;;  %v2114_v42 = vpop.eup %2113  ;;  %v1388_v4 = vmul.f32 0.6931472, %v2112_v21  ;;  %v1475_v7 = vsel %vm1363_vm4, %v1459_v49, 0.0  ;;  %v1581_v27 = vsel %vm690_vm13, %v1886_v63, 0.0 }
 0x24d   : > { %1321 = vst.msk [vmem:[#allocation5 + $0x78] sm:$0xff] %vm690_vm13, %v1305_v2  ;;  %v3179_v50 = vld [vmem:[#allocation5 + $0x38] sm:$0xff]  ;;  %v1456_v24 = vsub.f32 %v1380_v14, %v1428_v44  ;;  %v1497_v15 = vsel %vm690_vm13, %v1475_v7, 0.0 }
 0x24e   : > { %1221 = vst.msk [vmem:[#allocation4 + $0x58] sm:$0xff] %vm690_vm13, %v1204_v13  ;;  %vm1364_vm8 = vcmp.gt.f32.partialorder %v3179_v50, 0.0  ;;  %v1412_v36 = vmax.f32 %v3179_v50, 1e-37 }
 0x24f   : > { %v1881_v61 = vsel %vm1364_vm8, 1.0, %v2250_v5  ;;  %v1472_v35 = vsel %vm1360_vm3, %v1456_v24, 0.0 }
 0x250   : > { %2115 = vlog2.f32 %v1412_v36  ;;  %v1571_v28 = vsel %vm690_vm13, %v1881_v61, 0.0  ;;  %v1491_v30 = vsel %vm690_vm13, %v1472_v35, 0.0 }
 0x251   : > { %v1287_v18 = vpop.xlane.xlu1 %1286  ;;  %2117 = vlog2.f32 %v1417_v16  ;;  %v1572_v6 = vadd.f32 %v1571_v28, %v1570_v1  ;;  %v1492_v62 = vadd.f32 %v1491_v30, %v1490_v39 }
 0x252   : > { %v1304_v9 = vadd.f32 %v1287_v18, %v1240_v32  ;;  %v1190_v43 = vpop.xlane.xlu2 %1189  ;;  %2119 = vlog2.f32 %v1337_v33 }
 0x253   : > { %v1207_v10 = vadd.f32 %v1190_v43, %v1159_v29  ;;  %v3206_v0 = vld [vmem:[#allocation5 + $0x58] sm:$0xff]  ;;  %v1574_v58 = vadd.f32 %v3093_v22, %v1572_v6  ;;  %v1494_v60 = vadd.f32 %v3154_v19, %v1492_v62  ;;  %2121 = vlog2.f32 %v1338_v40 }
 0x254   : > { %1320 = vst.msk [vmem:[#allocation5 + $0x70] sm:$0xff] %vm690_vm13, %v1304_v9  ;;  %vm1368_vm1 = vcmp.gt.f32.partialorder %v3206_v0, 0.0  ;;  %v1416_v45 = vmax.f32 %v3206_v0, 1e-37  ;;  %v3217_v26 = vld [vmem:[#allocation5 + $0x78] sm:$0xff] }
 0x255   : > { %1224 = vst.msk [vmem:[#allocation4 + $0x70] sm:$0xff] %vm690_vm13, %v1207_v10  ;;  %v1885_v47 = vsel %vm1368_vm1, 1.0, %v2250_v5  ;;  %v1576_v22 = vadd.f32 %v3150_v41, %v1574_v58  ;;  %v1336_v8 = vld [vmem:[#allocation4 + $0x58] sm:$0xff]  ;;  %v1442_v19 = vmul.f32 0.6931472, %v2114_v42  ;;  %v1887_v41 = vsel %vm1370_vm0, 1.0, %v2250_v5 }
 0x256   : > { %v2116_v37 = vpop.eup %2115  ;;  %2123 = vlog2.f32 %v1416_v45  ;;  %vm1372_vm12 = vcmp.gt.f32.partialorder %v3217_v26, 0.0  ;;  %v1579_v34 = vsel %vm690_vm13, %v1885_v47, 0.0  ;;  %v1496_v13 = vadd.f32 %v1495_v54, %v1494_v60 }
 0x257   : > { %v2118_v53 = vpop.eup %2117  ;;  %2125 = vlog2.f32 %v1418_v12  ;;  %v1578_v11 = vadd.f32 %v1577_v23, %v1576_v22  ;;  %v1436_v2 = vmul.f32 0.6931472, %v2116_v37  ;;  %v1583_v17 = vsel %vm690_vm13, %v1887_v41, 0.0 }
 0x258   : > { %v2120_v57 = vpop.eup %2119  ;;  %2127 = vlog2.f32 %v1336_v8  ;;  %v1446_v16 = vmul.f32 0.6931472, %v2118_v53  ;;  %v1463_v25 = vsub.f32 %v3165_v59, %v1442_v19  ;;  %v1889_v48 = vsel %vm1372_vm12, 1.0, %v2250_v5 }
 0x259   : > { %v1192_v14 = vpop.xlane.xlu1 %1191  ;;  %v1580_v44 = vadd.f32 %v1579_v34, %v1578_v11  ;;  %v1460_v56 = vsub.f32 %v1388_v4, %v1436_v2  ;;  %v2122_v24 = vpop.eup %2121  ;;  %v1398_v32 = vmul.f32 0.6931472, %v2120_v57  ;;  %v1498_v39 = vadd.f32 %v1497_v15, %v1496_v13 }
 0x25a   : > { %v1208_v38 = vadd.f32 %v1192_v14, %v1160_v20  ;;  %v1420_v50 = vmax.f32 %v3217_v26, 1e-37  ;;  %v1400_v43 = vmul.f32 0.6931472, %v2122_v24  ;;  %v1501_v23 = vsel %vm690_vm13, %v3163_v51, 0.0 }
 0x25b   : > { %v1355_v36 = vld [vmem:[#allocation5 + $0x70] sm:$0xff]  ;;  %v1582_v31 = vadd.f32 %v1581_v27, %v1580_v44  ;;  %v1476_v61 = vsel %vm1364_vm8, %v1460_v56, 0.0  ;;  %v1587_v40 = vsel %vm690_vm13, %v1889_v48, 0.0  ;;  %v1465_v49 = vsub.f32 %v1398_v32, %v1446_v16 }
 0x25c   : > { %v2124_v1 = vpop.eup %2123  ;;  %1225 = vst.msk [vmem:[#allocation4 + $0x78] sm:$0xff] %vm690_vm13, %v1208_v38  ;;  %vm1371_vm6 = vcmp.gt.f32.partialorder %v1355_v36, 0.0  ;;  %v1419_v33 = vmax.f32 %v1355_v36, 1e-37  ;;  %v1339_v35 = vld [vmem:[#allocation4 + $0x70] sm:$0xff]  ;;  %v1499_v59 = vsel %vm690_vm13, %v1476_v61, 0.0 }
 0x25d   : > { %v2126_v29 = vpop.eup %2125  ;;  %v1888_v28 = vsel %vm1371_vm6, 1.0, %v2250_v5  ;;  %v1584_v30 = vadd.f32 %v1583_v17, %v1582_v31  ;;  %2129 = vlog2.f32 %v1339_v35  ;;  %v1444_v18 = vmul.f32 0.6931472, %v2124_v1 }
 0x25e   : > { %v2128_v6 = vpop.eup %2127  ;;  %2131 = vlog2.f32 %v1419_v33  ;;  %v1585_v62 = vsel %vm690_vm13, %v1888_v28, 0.0  ;;  %v1500_v54 = vadd.f32 %v1499_v59, %v1498_v39  ;;  %v1479_v5 = vsel %vm1367_vm5, %v1463_v25, 0.0 }
 0x25f   : > { %v1586_v21 = vadd.f32 %v1585_v62, %v1584_v30  ;;  %v1396_v9 = vmul.f32 0.6931472, %v2128_v6  ;;  %v1448_v12 = vmul.f32 0.6931472, %v2126_v29  ;;  %v1503_v45 = vsel %vm690_vm13, %v3200_v52, 0.0 }
 0x260   : > { %v1502_v42 = vadd.f32 %v1501_v23, %v1500_v54  ;;  %2133 = vlog2.f32 %v1420_v50  ;;  %v1505_v4 = vsel %vm690_vm13, %v1479_v5, 0.0  ;;  %v1481_v63 = vsel %vm1369_vm9, %v1465_v49, 0.0 }
 0x261   : > { %v1588_v10 = vadd.f32 %v1587_v40, %v1586_v21  ;;  %v1464_v58 = vsub.f32 %v1396_v9, %v1444_v18  ;;  %v1466_v8 = vsub.f32 %v1400_v43, %v1448_v12  ;;  %v1509_v0 = vsel %vm690_vm13, %v1481_v63, 0.0 }
 0x262   : > { %v1504_v60 = vadd.f32 %v1503_v45, %v1502_v42 }
 0x263   : > { %v2130_v47 = vpop.eup %2129  ;;  %1589 = vadd.xlane.f32.xlu0 %v1588_v10  ;;  %v1340_v22 = vld [vmem:[#allocation4 + $0x78] sm:$0xff]  ;;  %v1480_v51 = vsel %vm1368_vm1, %v1464_v58, 0.0  ;;  %v1482_v41 = vsel %vm1370_vm0, %v1466_v8, 0.0 }
 0x264   : > { %v2132_v46 = vpop.eup %2131  ;;  %v1402_v37 = vmul.f32 0.6931472, %v2130_v47  ;;  %2135 = vlog2.f32 %v1340_v22  ;;  %v1506_v19 = vadd.f32 %v1505_v4, %v1504_v60  ;;  %v1507_v52 = vsel %vm690_vm13, %v1480_v51, 0.0 }
 0x265   : > { %v1450_v7 = vmul.f32 0.6931472, %v2132_v46  ;;  %v1511_v13 = vsel %vm690_vm13, %v1482_v41, 0.0 }
 0x266   : > { %v1508_v53 = vadd.f32 %v1507_v52, %v1506_v19  ;;  %v2134_v11 = vpop.eup %2133 }
 0x267   : > { %v1467_v20 = vsub.f32 %v1402_v37, %v1450_v7  ;;  %v1452_v14 = vmul.f32 0.6931472, %v2134_v11 }
 0x268   : > { %v1510_v2 = vadd.f32 %v1509_v0, %v1508_v53 }
 0x269   : > { %v1483_v57 = vsel %vm1371_vm6, %v1467_v20, 0.0 }
 0x26a   : > { %v2136_v34 = vpop.eup %2135  ;;  %v1512_v44 = vadd.f32 %v1511_v13, %v1510_v2  ;;  %v1513_v27 = vsel %vm690_vm13, %v1483_v57, 0.0 }
 0x26b   : > { %v1404_v3 = vmul.f32 0.6931472, %v2136_v34 }
 0x26c   : > { %v1514_v55 = vadd.f32 %v1513_v27, %v1512_v44 }
 0x26d   : > { %v1468_v56 = vsub.f32 %v1404_v3, %v1452_v14 }
 0x26f   : > { %v1484_v15 = vsel %vm1372_vm12, %v1468_v56, 0.0 }
 0x270   : > { %v1515_v38 = vsel %vm690_vm13, %v1484_v15, 0.0 }
 0x271   : > { %v1516_v17 = vadd.f32 %v1515_v38, %v1514_v55 }
 0x273   : > { %1517 = vadd.xlane.f32.xlu2 %v1516_v17 }
 0x2d6   : > { %v1590_v16 = vpop.xlane.xlu0 %1589 }
 0x2d7   : > { %v1591_v25 = vrot.slane %v1590_v16, 4 }
 0x2d9   : > { %v1592_v24 = vadd.f32 %v1591_v25, %v1590_v16 }
 0x2db   : > { %v1593_v36 = vrot.slane %v1592_v24, 2 }
 0x2dd   : > { %v1594_v61 = vadd.f32 %v1593_v36, %v1592_v24 }
 0x2df   : > { %v1595_v35 = vrot.slane %v1594_v61, 1 }
 0x2e1   : > { %v1596_v59 = vadd.f32 %v1595_v35, %v1594_v61 }
 0x2e6   : > { %v1518_v48 = vpop.xlane.xlu2 %1517 }
 0x2e7   : > { %v1519_v31 = vrot.slane %v1518_v48, 4 }
 0x2e9   : > { %v1520_v32 = vadd.f32 %v1519_v31, %v1518_v48 }
 0x2eb   : > { %v1521_v1 = vrot.slane %v1520_v32, 2 }
 0x2ed   : > { %v1522_v33 = vadd.f32 %v1521_v1, %v1520_v32 }
 0x2ef   : > { %v1523_v26 = vrot.slane %v1522_v33, 1 }
 0x2f1   : > { %v1524_v39 = vadd.f32 %v1523_v26, %v1522_v33 }
 0x2f3   : > { %1938 = vpush %v1524_v39 }
 0x2f4   : > { %1940 = vpush %v1596_v59 }
 0x324   : > { %s1939_s21 = spop %1938 }
 0x325   : > { %v1598_v29 = vstv %s1939_s21  ;;  %s1941_s13 = spop %1940 }
 0x326   : > { %1599 = vst [vmem:[%s286_s29] sm:$0xff] %v1598_v29  ;;  %v1600_v28 = vstv %s1941_s13 }
 0x327   : > { %1601 = vst [vmem:[%s293_s16] sm:$0xff] %v1600_v28 }
 0x328   : > { %2164 = shalt.err (!%p2161_p5)
}
 0x329   : > { %1942 = dma.vmem_to_hbm [thread:$0]  (%p2321_p4), %s1621_s8, 128, %s1623_s9, %s1603_s14  }
 0x32a   : > { %s1608_s16 = scalar_lea.sflag [#allocation9], %s3271_s7  ;;  %s2179_s29 = sshra.s32 %s3283_s10, 4  ;;  %s2180_s29 = int_to_ptr.hbm [resolvable:$true] %s2179_s29 }
 0x32b   : > { %s2181_s13 = scalar_lea.hbm %s2180_s29, 8  ;;  %s2185_s11 = scalar_lea.hbm %s3337_s5, 16 }
 0x32c   : > { %p2182_p6 = scmp.ne.s32.totalorder %s2180_s29, %s2181_s13  ;;  %p2186_p10 = scmp.lt.s32.totalorder %s2180_s29, %s3337_s5 }
 0x32d   : > { %p2187_p11 = scmp.lt.s32.totalorder %s2185_s11, %s2181_s13 }
 0x32e   : > { %p2183_p7 = pnand %p2182_p6, %p2321_p4 }
 0x32f   : > { %p2188_p12 = por %p2187_p11, %p2186_p10 }
 0x330   : > { %p2184_p9 = pneg %p2183_p7 }
 0x332   : > { %p2189_p13 = pnand %p2188_p12, %p2184_p9 }
 0x334   : > { %2192 = shalt.err (!%p2189_p13)
}
 0x335   : > { %1943 = dma.vmem_to_hbm [thread:$0]  (%p2321_p4), %s3281_s17, 128, %s3283_s10, %s1608_s16  }
 0x336 PF: > { %p1953_p0 = scmp.ge.s32.totalorder %s2247_s23, 2  ;;  %s1648_s7 = sand.u32 1, %s2227_s18  }
 0x337   : > { %s1649_s8 = scalar_lea.sflag [#allocation7], %s1648_s7 }
 0x338   : > { %p1947_p1 = pnand %p1953_p0, %p2328_p8 }
 0x33a   : > { %p1948_p2 = pneg %p1947_p1 }
 0x33c   : > { %2218 = dma.done.wait (%p1948_p2), %s1649_s8, 128  }
 0x33d   : > { %2220 = vsyncadd (%p1948_p2), %s1649_s8, 4294967168  ;;  %s1659_s9 = scalar_lea.sflag [#allocation9], %s1648_s7 }
 0x33e   : > { %2222 = dma.done.wait (%p1948_p2), %s1659_s9, 128  }
 0x33f   : > { %2224 = vsyncadd (%p1948_p2), %s1659_s9, 4294967168  ;;  %s22_s23 = sadd.s32 1, %s2247_s23   ;;  %s3364_s18 = smov %s2231_s19 }
 0x340   : > { %p19_p3 = scmp.ge.s32.totalorder %s22_s23, 4   ;;  %s3365_s19 = smov %s2235_s20 }
 0x341   : > { %s3366_s20 = smov %s2334_s6  ;;  %s3367_s21 = smov %s2243_s22 }
 0x342   : > { %s3368_s22 = smov %s3370_s26  ;;  %21 = sbr.rel (!%p19_p3) target bundleno = 6 (0x6), region = 110 }
 0x347   :  { %1665 = vsyncpa [#allocation7], 1 }
 0x348   :  { %1667 = vsyncpa [#allocation7 + $0x1], 1 }
 0x349   :  { %1668 = vsyncpa [#allocation9], 1 }
 0x34a   :  { %1670 = vsyncpa [#allocation9 + $0x1], 1 }

</bundles_post_ra>
